<compile_context>
chip_gen: v6e
topology: v6e:2x2x1
jax: 0.10.0
libtpu: 0.0.40
codegen_flags: <defaults>
</compile_context>

<pallas_src>
import functools

import jax
import jax.numpy as jnp
from jax.experimental import pallas as pl
from jax.experimental.pallas import tpu as pltpu

K = 5          # CBAMBlock default kernel_size
P = K // 2     # "same" padding


def _shift_flat(s, d, hw):
    """t[:, i] = s[:, i + d] if 0 <= i + d < hw else 0 (d is a static int)."""
    if d == 0:
        return s
    bt = s.shape[0]
    if d > 0:
        z = jnp.zeros((bt, d), s.dtype)
        return jnp.concatenate([s[:, d:], z], axis=1)
    z = jnp.zeros((bt, -d), s.dtype)
    return jnp.concatenate([z, s[:, :hw + d]], axis=1)


def _cbam_kernel(x_ref, col_ref, w_ref, b_ref, o_ref, *, width, ksize):
    # x_ref/o_ref: (Bt, C, H*W) VMEM (lane-dense last dim)
    # col_ref:     (1, H*W) int32 VMEM (column index of each flat pixel)
    # w_ref:       (2*K*K,) f32 SMEM (conv weight, OIHW flat, O=1, I=2)
    # b_ref:       (1,)     f32 SMEM (conv bias)
    bt, _, hw = x_ref.shape
    p = ksize // 2

    x = x_ref[...]                               # (Bt, C, HW), native dtype
    xf = x.astype(jnp.float32)
    maxs = jnp.max(xf, axis=1)                   # (Bt, HW) -- torch.max(dim=1)
    avgs = jnp.mean(xf, axis=1)                  # (Bt, HW) -- torch.mean(dim=1)

    col = col_ref[...]                           # (1, HW) int32

    # 2->1 KxK conv, padding=K//2, fully unrolled. Vertical out-of-range taps
    # are handled by the zero fill of _shift_flat; horizontal wrap across row
    # boundaries is killed with the column masks.
    acc = jnp.full((bt, hw), b_ref[0], jnp.float32)
    for kh in range(ksize):
        dh = kh - p
        for kw in range(ksize):
            dw = kw - p
            d = dh * width + dw
            sm = _shift_flat(maxs, d, hw)
            sa = _shift_flat(avgs, d, hw)
            if dw > 0:
                m = col < (width - dw)
            elif dw < 0:
                m = col >= (-dw)
            else:
                m = None
            if m is not None:
                sm = jnp.where(m, sm, 0.0)
                sa = jnp.where(m, sa, 0.0)
            acc = acc + sm * w_ref[kh * ksize + kw] \
                      + sa * w_ref[ksize * ksize + kh * ksize + kw]

    attn = jax.nn.sigmoid(acc).astype(o_ref.dtype)   # (Bt, HW)
    o_ref[...] = x * attn[:, None, :]                # broadcast over channels


def cbam_block(x, weight, bias, *,
               block_target_bytes=8 * 1024 * 1024,
               vmem_limit_bytes=48 * 1024 * 1024):
    """x: (B,C,H,W); weight: (1,2,K,K); bias: (1,). out = x * sigmoid(conv([max_c, mean_c]))."""
    B, C, H, W = x.shape
    HW = H * W
    ksize = weight.shape[-1]

    x_flat = x.reshape(B, C, HW)                        # lane-dense last dim
    col_ids = (jnp.arange(HW, dtype=jnp.int32) % W).reshape(1, HW)
    w_flat = weight.reshape(-1).astype(jnp.float32)
    b_flat = bias.reshape(-1).astype(jnp.float32)

    # Batch tile: aim for multi-MiB blocks, keep >=2 grid steps when B >= 2
    # (v7x megacore), and require B % bt == 0 for clean blocking.
    per_img = C * HW * x.dtype.itemsize
    bt = max(1, min(B, block_target_bytes // max(per_img, 1)))
    if B >= 2:
        bt = min(bt, B // 2)
    while B % bt:
        bt -= 1
    grid = (B // bt,)

    kernel = functools.partial(_cbam_kernel, width=W, ksize=ksize)
    out = pl.pallas_call(
        kernel,
        out_shape=jax.ShapeDtypeStruct((B, C, HW), x.dtype),
        grid=grid,
        in_specs=[
            pl.BlockSpec((bt, C, HW), lambda b: (b, 0, 0)),
            pl.BlockSpec((1, HW), lambda b: (0, 0)),
            pl.BlockSpec(memory_space=pltpu.MemorySpace.SMEM),
            pl.BlockSpec(memory_space=pltpu.MemorySpace.SMEM),
        ],
        out_specs=pl.BlockSpec((bt, C, HW), lambda b: (b, 0, 0)),
        compiler_params=pltpu.CompilerParams(
            dimension_semantics=("parallel",),
            vmem_limit_bytes=vmem_limit_bytes),
    )(x_flat, col_ids, w_flat, b_flat)
    return out.reshape(B, C, H, W)


if __name__ == "__main__":
    key = jax.random.PRNGKey(0)
    kx, kw = jax.random.split(key)

    B, C, H, W = 2, 4, 16, 16
    x = jax.random.normal(kx, (B, C, H, W), jnp.float32)

    # Conv2d(2, 1, 5, padding=2) params: kaiming-normal-like weight, zero bias.
    fan_out = 1 * K * K
    weight = jax.random.normal(kw, (1, 2, K, K), jnp.float32) * jnp.sqrt(2.0 / fan_out)
    bias = jnp.zeros((1,), jnp.float32)

    out = jax.block_until_ready(cbam_block(x, weight, bias))

    # Pure-JAX reference for validation
    stat = jnp.concatenate(
        [jnp.max(x, axis=1, keepdims=True), jnp.mean(x, axis=1, keepdims=True)],
        axis=1)
    conv = jax.lax.conv_general_dilated(
        stat, weight, window_strides=(1, 1), padding=[(P, P), (P, P)],
        dimension_numbers=("NCHW", "OIHW", "NCHW"))
    ref = x * jax.nn.sigmoid(conv + bias.reshape(1, 1, 1, 1))

    assert out.shape == (B, C, H, W)
    assert jnp.allclose(out, ref, atol=1e-5, rtol=1e-5), "mismatch vs reference"
    print("KERNEL_OK")
</pallas_src>

<mosaic_0001>
module attributes {stable_mosaic.version = 11 : i64} {
  func.func @_cbam_kernel(%arg0: i32, %arg1: memref<1x4x256xf32, #tpu.memory_space<vmem>>, %arg2: memref<1x256xi32, #tpu.memory_space<vmem>>, %arg3: memref<50xf32, #tpu.memory_space<smem>>, %arg4: memref<1xf32, #tpu.memory_space<smem>>, %arg5: memref<1x4x256xf32, #tpu.memory_space<vmem>>) attributes {dimension_semantics = [#tpu.dimension_semantics<parallel>], iteration_bounds = array<i64: 2>, scalar_prefetch = 0 : i64, scratch_operands = 0 : i64, tpu.core_type = #tpu.core_type<tc>, window_params = [{transform_indices = @transform_0, window_bounds = array<i64: 1, 4, 256>}, {pipeline_mode = #tpu.pipeline_mode<synchronous>, transform_indices = @transform_1, window_bounds = array<i64: 1, 256>}, {transform_indices = @transform_2, window_bounds = array<i64: 50>}, {transform_indices = @transform_3, window_bounds = array<i64: 1>}, {transform_indices = @transform_4, window_bounds = array<i64: 1, 4, 256>}]} {
    %c0 = arith.constant 0 : index
    %c0_0 = arith.constant 0 : index
    %c0_1 = arith.constant 0 : index
    %0 = vector.load %arg1[%c0, %c0_0, %c0_1] : memref<1x4x256xf32, #tpu.memory_space<vmem>>, vector<1x4x256xf32>
    %cst = arith.constant dense<0xFF800000> : vector<1x256xf32>
    %1 = vector.multi_reduction <maximumf>, %0, %cst [1] : vector<1x4x256xf32> to vector<1x256xf32>
    %cst_2 = arith.constant dense<0.000000e+00> : vector<1x256xf32>
    %2 = vector.multi_reduction <add>, %0, %cst_2 [1] : vector<1x4x256xf32> to vector<1x256xf32>
    %cst_3 = arith.constant 4.000000e+00 : f32
    %3 = vector.broadcast %cst_3 : f32 to vector<1x256xf32>
    %4 = arith.divf %2, %3 : vector<1x256xf32>
    %c0_4 = arith.constant 0 : index
    %c0_5 = arith.constant 0 : index
    %5 = vector.load %arg2[%c0_4, %c0_5] : memref<1x256xi32, #tpu.memory_space<vmem>>, vector<1x256xi32>
    %c0_6 = arith.constant 0 : index
    %6 = memref.load %arg4[%c0_6] : memref<1xf32, #tpu.memory_space<smem>>
    %7 = vector.broadcast %6 : f32 to vector<1x256xf32>
    %cst_7 = arith.constant 0.000000e+00 : f32
    %8 = vector.broadcast %cst_7 : f32 to vector<1x34xf32>
    %9 = vector.extract_strided_slice %1 {offsets = [0, 0], sizes = [1, 222], strides = [1, 1]} : vector<1x256xf32> to vector<1x222xf32>
    %10 = tpu.concatenate %8, %9 in 1 : vector<1x34xf32>, vector<1x222xf32> -> vector<1x256xf32>
    %cst_8 = arith.constant 0.000000e+00 : f32
    %11 = vector.broadcast %cst_8 : f32 to vector<1x34xf32>
    %12 = vector.extract_strided_slice %4 {offsets = [0, 0], sizes = [1, 222], strides = [1, 1]} : vector<1x256xf32> to vector<1x222xf32>
    %13 = tpu.concatenate %11, %12 in 1 : vector<1x34xf32>, vector<1x222xf32> -> vector<1x256xf32>
    %c2_i32 = arith.constant 2 : i32
    %14 = vector.broadcast %c2_i32 : i32 to vector<1x256xi32>
    %15 = arith.cmpi sge, %5, %14 : vector<1x256xi32>
    %cst_9 = arith.constant 0.000000e+00 : f32
    %16 = vector.broadcast %cst_9 : f32 to vector<1x256xf32>
    %17 = arith.select %15, %10, %16 : vector<1x256xi1>, vector<1x256xf32>
    %cst_10 = arith.constant 0.000000e+00 : f32
    %18 = vector.broadcast %cst_10 : f32 to vector<1x256xf32>
    %19 = arith.select %15, %13, %18 : vector<1x256xi1>, vector<1x256xf32>
    %c0_11 = arith.constant 0 : index
    %20 = memref.load %arg3[%c0_11] : memref<50xf32, #tpu.memory_space<smem>>
    %21 = vector.broadcast %20 : f32 to vector<1x256xf32>
    %22 = arith.mulf %17, %21 : vector<1x256xf32>
    %23 = arith.addf %7, %22 : vector<1x256xf32>
    %c25 = arith.constant 25 : index
    %24 = memref.load %arg3[%c25] : memref<50xf32, #tpu.memory_space<smem>>
    %25 = vector.broadcast %24 : f32 to vector<1x256xf32>
    %26 = arith.mulf %19, %25 : vector<1x256xf32>
    %27 = arith.addf %23, %26 : vector<1x256xf32>
    %cst_12 = arith.constant 0.000000e+00 : f32
    %28 = vector.broadcast %cst_12 : f32 to vector<1x33xf32>
    %29 = vector.extract_strided_slice %1 {offsets = [0, 0], sizes = [1, 223], strides = [1, 1]} : vector<1x256xf32> to vector<1x223xf32>
    %30 = tpu.concatenate %28, %29 in 1 : vector<1x33xf32>, vector<1x223xf32> -> vector<1x256xf32>
    %cst_13 = arith.constant 0.000000e+00 : f32
    %31 = vector.broadcast %cst_13 : f32 to vector<1x33xf32>
    %32 = vector.extract_strided_slice %4 {offsets = [0, 0], sizes = [1, 223], strides = [1, 1]} : vector<1x256xf32> to vector<1x223xf32>
    %33 = tpu.concatenate %31, %32 in 1 : vector<1x33xf32>, vector<1x223xf32> -> vector<1x256xf32>
    %c1_i32 = arith.constant 1 : i32
    %34 = vector.broadcast %c1_i32 : i32 to vector<1x256xi32>
    %35 = arith.cmpi sge, %5, %34 : vector<1x256xi32>
    %cst_14 = arith.constant 0.000000e+00 : f32
    %36 = vector.broadcast %cst_14 : f32 to vector<1x256xf32>
    %37 = arith.select %35, %30, %36 : vector<1x256xi1>, vector<1x256xf32>
    %cst_15 = arith.constant 0.000000e+00 : f32
    %38 = vector.broadcast %cst_15 : f32 to vector<1x256xf32>
    %39 = arith.select %35, %33, %38 : vector<1x256xi1>, vector<1x256xf32>
    %c1 = arith.constant 1 : index
    %40 = memref.load %arg3[%c1] : memref<50xf32, #tpu.memory_space<smem>>
    %41 = vector.broadcast %40 : f32 to vector<1x256xf32>
    %42 = arith.mulf %37, %41 : vector<1x256xf32>
    %43 = arith.addf %27, %42 : vector<1x256xf32>
    %c26 = arith.constant 26 : index
    %44 = memref.load %arg3[%c26] : memref<50xf32, #tpu.memory_space<smem>>
    %45 = vector.broadcast %44 : f32 to vector<1x256xf32>
    %46 = arith.mulf %39, %45 : vector<1x256xf32>
    %47 = arith.addf %43, %46 : vector<1x256xf32>
    %cst_16 = arith.constant 0.000000e+00 : f32
    %48 = vector.broadcast %cst_16 : f32 to vector<1x32xf32>
    %49 = vector.extract_strided_slice %1 {offsets = [0, 0], sizes = [1, 224], strides = [1, 1]} : vector<1x256xf32> to vector<1x224xf32>
    %50 = tpu.concatenate %48, %49 in 1 : vector<1x32xf32>, vector<1x224xf32> -> vector<1x256xf32>
    %cst_17 = arith.constant 0.000000e+00 : f32
    %51 = vector.broadcast %cst_17 : f32 to vector<1x32xf32>
    %52 = vector.extract_strided_slice %4 {offsets = [0, 0], sizes = [1, 224], strides = [1, 1]} : vector<1x256xf32> to vector<1x224xf32>
    %53 = tpu.concatenate %51, %52 in 1 : vector<1x32xf32>, vector<1x224xf32> -> vector<1x256xf32>
    %c2 = arith.constant 2 : index
    %54 = memref.load %arg3[%c2] : memref<50xf32, #tpu.memory_space<smem>>
    %55 = vector.broadcast %54 : f32 to vector<1x256xf32>
    %56 = arith.mulf %50, %55 : vector<1x256xf32>
    %57 = arith.addf %47, %56 : vector<1x256xf32>
    %c27 = arith.constant 27 : index
    %58 = memref.load %arg3[%c27] : memref<50xf32, #tpu.memory_space<smem>>
    %59 = vector.broadcast %58 : f32 to vector<1x256xf32>
    %60 = arith.mulf %53, %59 : vector<1x256xf32>
    %61 = arith.addf %57, %60 : vector<1x256xf32>
    %cst_18 = arith.constant 0.000000e+00 : f32
    %62 = vector.broadcast %cst_18 : f32 to vector<1x31xf32>
    %63 = vector.extract_strided_slice %1 {offsets = [0, 0], sizes = [1, 225], strides = [1, 1]} : vector<1x256xf32> to vector<1x225xf32>
    %64 = tpu.concatenate %62, %63 in 1 : vector<1x31xf32>, vector<1x225xf32> -> vector<1x256xf32>
    %cst_19 = arith.constant 0.000000e+00 : f32
    %65 = vector.broadcast %cst_19 : f32 to vector<1x31xf32>
    %66 = vector.extract_strided_slice %4 {offsets = [0, 0], sizes = [1, 225], strides = [1, 1]} : vector<1x256xf32> to vector<1x225xf32>
    %67 = tpu.concatenate %65, %66 in 1 : vector<1x31xf32>, vector<1x225xf32> -> vector<1x256xf32>
    %c15_i32 = arith.constant 15 : i32
    %68 = vector.broadcast %c15_i32 : i32 to vector<1x256xi32>
    %69 = arith.cmpi slt, %5, %68 : vector<1x256xi32>
    %cst_20 = arith.constant 0.000000e+00 : f32
    %70 = vector.broadcast %cst_20 : f32 to vector<1x256xf32>
    %71 = arith.select %69, %64, %70 : vector<1x256xi1>, vector<1x256xf32>
    %cst_21 = arith.constant 0.000000e+00 : f32
    %72 = vector.broadcast %cst_21 : f32 to vector<1x256xf32>
    %73 = arith.select %69, %67, %72 : vector<1x256xi1>, vector<1x256xf32>
    %c3 = arith.constant 3 : index
    %74 = memref.load %arg3[%c3] : memref<50xf32, #tpu.memory_space<smem>>
    %75 = vector.broadcast %74 : f32 to vector<1x256xf32>
    %76 = arith.mulf %71, %75 : vector<1x256xf32>
    %77 = arith.addf %61, %76 : vector<1x256xf32>
    %c28 = arith.constant 28 : index
    %78 = memref.load %arg3[%c28] : memref<50xf32, #tpu.memory_space<smem>>
    %79 = vector.broadcast %78 : f32 to vector<1x256xf32>
    %80 = arith.mulf %73, %79 : vector<1x256xf32>
    %81 = arith.addf %77, %80 : vector<1x256xf32>
    %cst_22 = arith.constant 0.000000e+00 : f32
    %82 = vector.broadcast %cst_22 : f32 to vector<1x30xf32>
    %83 = vector.extract_strided_slice %1 {offsets = [0, 0], sizes = [1, 226], strides = [1, 1]} : vector<1x256xf32> to vector<1x226xf32>
    %84 = tpu.concatenate %82, %83 in 1 : vector<1x30xf32>, vector<1x226xf32> -> vector<1x256xf32>
    %cst_23 = arith.constant 0.000000e+00 : f32
    %85 = vector.broadcast %cst_23 : f32 to vector<1x30xf32>
    %86 = vector.extract_strided_slice %4 {offsets = [0, 0], sizes = [1, 226], strides = [1, 1]} : vector<1x256xf32> to vector<1x226xf32>
    %87 = tpu.concatenate %85, %86 in 1 : vector<1x30xf32>, vector<1x226xf32> -> vector<1x256xf32>
    %c14_i32 = arith.constant 14 : i32
    %88 = vector.broadcast %c14_i32 : i32 to vector<1x256xi32>
    %89 = arith.cmpi slt, %5, %88 : vector<1x256xi32>
    %cst_24 = arith.constant 0.000000e+00 : f32
    %90 = vector.broadcast %cst_24 : f32 to vector<1x256xf32>
    %91 = arith.select %89, %84, %90 : vector<1x256xi1>, vector<1x256xf32>
    %cst_25 = arith.constant 0.000000e+00 : f32
    %92 = vector.broadcast %cst_25 : f32 to vector<1x256xf32>
    %93 = arith.select %89, %87, %92 : vector<1x256xi1>, vector<1x256xf32>
    %c4 = arith.constant 4 : index
    %94 = memref.load %arg3[%c4] : memref<50xf32, #tpu.memory_space<smem>>
    %95 = vector.broadcast %94 : f32 to vector<1x256xf32>
    %96 = arith.mulf %91, %95 : vector<1x256xf32>
    %97 = arith.addf %81, %96 : vector<1x256xf32>
    %c29 = arith.constant 29 : index
    %98 = memref.load %arg3[%c29] : memref<50xf32, #tpu.memory_space<smem>>
    %99 = vector.broadcast %98 : f32 to vector<1x256xf32>
    %100 = arith.mulf %93, %99 : vector<1x256xf32>
    %101 = arith.addf %97, %100 : vector<1x256xf32>
    %cst_26 = arith.constant 0.000000e+00 : f32
    %102 = vector.broadcast %cst_26 : f32 to vector<1x18xf32>
    %103 = vector.extract_strided_slice %1 {offsets = [0, 0], sizes = [1, 238], strides = [1, 1]} : vector<1x256xf32> to vector<1x238xf32>
    %104 = tpu.concatenate %102, %103 in 1 : vector<1x18xf32>, vector<1x238xf32> -> vector<1x256xf32>
    %cst_27 = arith.constant 0.000000e+00 : f32
    %105 = vector.broadcast %cst_27 : f32 to vector<1x18xf32>
    %106 = vector.extract_strided_slice %4 {offsets = [0, 0], sizes = [1, 238], strides = [1, 1]} : vector<1x256xf32> to vector<1x238xf32>
    %107 = tpu.concatenate %105, %106 in 1 : vector<1x18xf32>, vector<1x238xf32> -> vector<1x256xf32>
    %c2_i32_28 = arith.constant 2 : i32
    %108 = vector.broadcast %c2_i32_28 : i32 to vector<1x256xi32>
    %109 = arith.cmpi sge, %5, %108 : vector<1x256xi32>
    %cst_29 = arith.constant 0.000000e+00 : f32
    %110 = vector.broadcast %cst_29 : f32 to vector<1x256xf32>
    %111 = arith.select %109, %104, %110 : vector<1x256xi1>, vector<1x256xf32>
    %cst_30 = arith.constant 0.000000e+00 : f32
    %112 = vector.broadcast %cst_30 : f32 to vector<1x256xf32>
    %113 = arith.select %109, %107, %112 : vector<1x256xi1>, vector<1x256xf32>
    %c5 = arith.constant 5 : index
    %114 = memref.load %arg3[%c5] : memref<50xf32, #tpu.memory_space<smem>>
    %115 = vector.broadcast %114 : f32 to vector<1x256xf32>
    %116 = arith.mulf %111, %115 : vector<1x256xf32>
    %117 = arith.addf %101, %116 : vector<1x256xf32>
    %c30 = arith.constant 30 : index
    %118 = memref.load %arg3[%c30] : memref<50xf32, #tpu.memory_space<smem>>
    %119 = vector.broadcast %118 : f32 to vector<1x256xf32>
    %120 = arith.mulf %113, %119 : vector<1x256xf32>
    %121 = arith.addf %117, %120 : vector<1x256xf32>
    %cst_31 = arith.constant 0.000000e+00 : f32
    %122 = vector.broadcast %cst_31 : f32 to vector<1x17xf32>
    %123 = vector.extract_strided_slice %1 {offsets = [0, 0], sizes = [1, 239], strides = [1, 1]} : vector<1x256xf32> to vector<1x239xf32>
    %124 = tpu.concatenate %122, %123 in 1 : vector<1x17xf32>, vector<1x239xf32> -> vector<1x256xf32>
    %cst_32 = arith.constant 0.000000e+00 : f32
    %125 = vector.broadcast %cst_32 : f32 to vector<1x17xf32>
    %126 = vector.extract_strided_slice %4 {offsets = [0, 0], sizes = [1, 239], strides = [1, 1]} : vector<1x256xf32> to vector<1x239xf32>
    %127 = tpu.concatenate %125, %126 in 1 : vector<1x17xf32>, vector<1x239xf32> -> vector<1x256xf32>
    %c1_i32_33 = arith.constant 1 : i32
    %128 = vector.broadcast %c1_i32_33 : i32 to vector<1x256xi32>
    %129 = arith.cmpi sge, %5, %128 : vector<1x256xi32>
    %cst_34 = arith.constant 0.000000e+00 : f32
    %130 = vector.broadcast %cst_34 : f32 to vector<1x256xf32>
    %131 = arith.select %129, %124, %130 : vector<1x256xi1>, vector<1x256xf32>
    %cst_35 = arith.constant 0.000000e+00 : f32
    %132 = vector.broadcast %cst_35 : f32 to vector<1x256xf32>
    %133 = arith.select %129, %127, %132 : vector<1x256xi1>, vector<1x256xf32>
    %c6 = arith.constant 6 : index
    %134 = memref.load %arg3[%c6] : memref<50xf32, #tpu.memory_space<smem>>
    %135 = vector.broadcast %134 : f32 to vector<1x256xf32>
    %136 = arith.mulf %131, %135 : vector<1x256xf32>
    %137 = arith.addf %121, %136 : vector<1x256xf32>
    %c31 = arith.constant 31 : index
    %138 = memref.load %arg3[%c31] : memref<50xf32, #tpu.memory_space<smem>>
    %139 = vector.broadcast %138 : f32 to vector<1x256xf32>
    %140 = arith.mulf %133, %139 : vector<1x256xf32>
    %141 = arith.addf %137, %140 : vector<1x256xf32>
    %cst_36 = arith.constant 0.000000e+00 : f32
    %142 = vector.broadcast %cst_36 : f32 to vector<1x16xf32>
    %143 = vector.extract_strided_slice %1 {offsets = [0, 0], sizes = [1, 240], strides = [1, 1]} : vector<1x256xf32> to vector<1x240xf32>
    %144 = tpu.concatenate %142, %143 in 1 : vector<1x16xf32>, vector<1x240xf32> -> vector<1x256xf32>
    %cst_37 = arith.constant 0.000000e+00 : f32
    %145 = vector.broadcast %cst_37 : f32 to vector<1x16xf32>
    %146 = vector.extract_strided_slice %4 {offsets = [0, 0], sizes = [1, 240], strides = [1, 1]} : vector<1x256xf32> to vector<1x240xf32>
    %147 = tpu.concatenate %145, %146 in 1 : vector<1x16xf32>, vector<1x240xf32> -> vector<1x256xf32>
    %c7 = arith.constant 7 : index
    %148 = memref.load %arg3[%c7] : memref<50xf32, #tpu.memory_space<smem>>
    %149 = vector.broadcast %148 : f32 to vector<1x256xf32>
    %150 = arith.mulf %144, %149 : vector<1x256xf32>
    %151 = arith.addf %141, %150 : vector<1x256xf32>
    %c32 = arith.constant 32 : index
    %152 = memref.load %arg3[%c32] : memref<50xf32, #tpu.memory_space<smem>>
    %153 = vector.broadcast %152 : f32 to vector<1x256xf32>
    %154 = arith.mulf %147, %153 : vector<1x256xf32>
    %155 = arith.addf %151, %154 : vector<1x256xf32>
    %cst_38 = arith.constant 0.000000e+00 : f32
    %156 = vector.broadcast %cst_38 : f32 to vector<1x15xf32>
    %157 = vector.extract_strided_slice %1 {offsets = [0, 0], sizes = [1, 241], strides = [1, 1]} : vector<1x256xf32> to vector<1x241xf32>
    %158 = tpu.concatenate %156, %157 in 1 : vector<1x15xf32>, vector<1x241xf32> -> vector<1x256xf32>
    %cst_39 = arith.constant 0.000000e+00 : f32
    %159 = vector.broadcast %cst_39 : f32 to vector<1x15xf32>
    %160 = vector.extract_strided_slice %4 {offsets = [0, 0], sizes = [1, 241], strides = [1, 1]} : vector<1x256xf32> to vector<1x241xf32>
    %161 = tpu.concatenate %159, %160 in 1 : vector<1x15xf32>, vector<1x241xf32> -> vector<1x256xf32>
    %c15_i32_40 = arith.constant 15 : i32
    %162 = vector.broadcast %c15_i32_40 : i32 to vector<1x256xi32>
    %163 = arith.cmpi slt, %5, %162 : vector<1x256xi32>
    %cst_41 = arith.constant 0.000000e+00 : f32
    %164 = vector.broadcast %cst_41 : f32 to vector<1x256xf32>
    %165 = arith.select %163, %158, %164 : vector<1x256xi1>, vector<1x256xf32>
    %cst_42 = arith.constant 0.000000e+00 : f32
    %166 = vector.broadcast %cst_42 : f32 to vector<1x256xf32>
    %167 = arith.select %163, %161, %166 : vector<1x256xi1>, vector<1x256xf32>
    %c8 = arith.constant 8 : index
    %168 = memref.load %arg3[%c8] : memref<50xf32, #tpu.memory_space<smem>>
    %169 = vector.broadcast %168 : f32 to vector<1x256xf32>
    %170 = arith.mulf %165, %169 : vector<1x256xf32>
    %171 = arith.addf %155, %170 : vector<1x256xf32>
    %c33 = arith.constant 33 : index
    %172 = memref.load %arg3[%c33] : memref<50xf32, #tpu.memory_space<smem>>
    %173 = vector.broadcast %172 : f32 to vector<1x256xf32>
    %174 = arith.mulf %167, %173 : vector<1x256xf32>
    %175 = arith.addf %171, %174 : vector<1x256xf32>
    %cst_43 = arith.constant 0.000000e+00 : f32
    %176 = vector.broadcast %cst_43 : f32 to vector<1x14xf32>
    %177 = vector.extract_strided_slice %1 {offsets = [0, 0], sizes = [1, 242], strides = [1, 1]} : vector<1x256xf32> to vector<1x242xf32>
    %178 = tpu.concatenate %176, %177 in 1 : vector<1x14xf32>, vector<1x242xf32> -> vector<1x256xf32>
    %cst_44 = arith.constant 0.000000e+00 : f32
    %179 = vector.broadcast %cst_44 : f32 to vector<1x14xf32>
    %180 = vector.extract_strided_slice %4 {offsets = [0, 0], sizes = [1, 242], strides = [1, 1]} : vector<1x256xf32> to vector<1x242xf32>
    %181 = tpu.concatenate %179, %180 in 1 : vector<1x14xf32>, vector<1x242xf32> -> vector<1x256xf32>
    %c14_i32_45 = arith.constant 14 : i32
    %182 = vector.broadcast %c14_i32_45 : i32 to vector<1x256xi32>
    %183 = arith.cmpi slt, %5, %182 : vector<1x256xi32>
    %cst_46 = arith.constant 0.000000e+00 : f32
    %184 = vector.broadcast %cst_46 : f32 to vector<1x256xf32>
    %185 = arith.select %183, %178, %184 : vector<1x256xi1>, vector<1x256xf32>
    %cst_47 = arith.constant 0.000000e+00 : f32
    %186 = vector.broadcast %cst_47 : f32 to vector<1x256xf32>
    %187 = arith.select %183, %181, %186 : vector<1x256xi1>, vector<1x256xf32>
    %c9 = arith.constant 9 : index
    %188 = memref.load %arg3[%c9] : memref<50xf32, #tpu.memory_space<smem>>
    %189 = vector.broadcast %188 : f32 to vector<1x256xf32>
    %190 = arith.mulf %185, %189 : vector<1x256xf32>
    %191 = arith.addf %175, %190 : vector<1x256xf32>
    %c34 = arith.constant 34 : index
    %192 = memref.load %arg3[%c34] : memref<50xf32, #tpu.memory_space<smem>>
    %193 = vector.broadcast %192 : f32 to vector<1x256xf32>
    %194 = arith.mulf %187, %193 : vector<1x256xf32>
    %195 = arith.addf %191, %194 : vector<1x256xf32>
    %cst_48 = arith.constant 0.000000e+00 : f32
    %196 = vector.broadcast %cst_48 : f32 to vector<1x2xf32>
    %197 = vector.extract_strided_slice %1 {offsets = [0, 0], sizes = [1, 254], strides = [1, 1]} : vector<1x256xf32> to vector<1x254xf32>
    %198 = tpu.concatenate %196, %197 in 1 : vector<1x2xf32>, vector<1x254xf32> -> vector<1x256xf32>
    %cst_49 = arith.constant 0.000000e+00 : f32
    %199 = vector.broadcast %cst_49 : f32 to vector<1x2xf32>
    %200 = vector.extract_strided_slice %4 {offsets = [0, 0], sizes = [1, 254], strides = [1, 1]} : vector<1x256xf32> to vector<1x254xf32>
    %201 = tpu.concatenate %199, %200 in 1 : vector<1x2xf32>, vector<1x254xf32> -> vector<1x256xf32>
    %c2_i32_50 = arith.constant 2 : i32
    %202 = vector.broadcast %c2_i32_50 : i32 to vector<1x256xi32>
    %203 = arith.cmpi sge, %5, %202 : vector<1x256xi32>
    %cst_51 = arith.constant 0.000000e+00 : f32
    %204 = vector.broadcast %cst_51 : f32 to vector<1x256xf32>
    %205 = arith.select %203, %198, %204 : vector<1x256xi1>, vector<1x256xf32>
    %cst_52 = arith.constant 0.000000e+00 : f32
    %206 = vector.broadcast %cst_52 : f32 to vector<1x256xf32>
    %207 = arith.select %203, %201, %206 : vector<1x256xi1>, vector<1x256xf32>
    %c10 = arith.constant 10 : index
    %208 = memref.load %arg3[%c10] : memref<50xf32, #tpu.memory_space<smem>>
    %209 = vector.broadcast %208 : f32 to vector<1x256xf32>
    %210 = arith.mulf %205, %209 : vector<1x256xf32>
    %211 = arith.addf %195, %210 : vector<1x256xf32>
    %c35 = arith.constant 35 : index
    %212 = memref.load %arg3[%c35] : memref<50xf32, #tpu.memory_space<smem>>
    %213 = vector.broadcast %212 : f32 to vector<1x256xf32>
    %214 = arith.mulf %207, %213 : vector<1x256xf32>
    %215 = arith.addf %211, %214 : vector<1x256xf32>
    %cst_53 = arith.constant 0.000000e+00 : f32
    %216 = vector.broadcast %cst_53 : f32 to vector<1x1xf32>
    %217 = vector.extract_strided_slice %1 {offsets = [0, 0], sizes = [1, 255], strides = [1, 1]} : vector<1x256xf32> to vector<1x255xf32>
    %218 = tpu.concatenate %216, %217 in 1 : vector<1x1xf32>, vector<1x255xf32> -> vector<1x256xf32>
    %cst_54 = arith.constant 0.000000e+00 : f32
    %219 = vector.broadcast %cst_54 : f32 to vector<1x1xf32>
    %220 = vector.extract_strided_slice %4 {offsets = [0, 0], sizes = [1, 255], strides = [1, 1]} : vector<1x256xf32> to vector<1x255xf32>
    %221 = tpu.concatenate %219, %220 in 1 : vector<1x1xf32>, vector<1x255xf32> -> vector<1x256xf32>
    %c1_i32_55 = arith.constant 1 : i32
    %222 = vector.broadcast %c1_i32_55 : i32 to vector<1x256xi32>
    %223 = arith.cmpi sge, %5, %222 : vector<1x256xi32>
    %cst_56 = arith.constant 0.000000e+00 : f32
    %224 = vector.broadcast %cst_56 : f32 to vector<1x256xf32>
    %225 = arith.select %223, %218, %224 : vector<1x256xi1>, vector<1x256xf32>
    %cst_57 = arith.constant 0.000000e+00 : f32
    %226 = vector.broadcast %cst_57 : f32 to vector<1x256xf32>
    %227 = arith.select %223, %221, %226 : vector<1x256xi1>, vector<1x256xf32>
    %c11 = arith.constant 11 : index
    %228 = memref.load %arg3[%c11] : memref<50xf32, #tpu.memory_space<smem>>
    %229 = vector.broadcast %228 : f32 to vector<1x256xf32>
    %230 = arith.mulf %225, %229 : vector<1x256xf32>
    %231 = arith.addf %215, %230 : vector<1x256xf32>
    %c36 = arith.constant 36 : index
    %232 = memref.load %arg3[%c36] : memref<50xf32, #tpu.memory_space<smem>>
    %233 = vector.broadcast %232 : f32 to vector<1x256xf32>
    %234 = arith.mulf %227, %233 : vector<1x256xf32>
    %235 = arith.addf %231, %234 : vector<1x256xf32>
    %c12 = arith.constant 12 : index
    %236 = memref.load %arg3[%c12] : memref<50xf32, #tpu.memory_space<smem>>
    %237 = vector.broadcast %236 : f32 to vector<1x256xf32>
    %238 = arith.mulf %1, %237 : vector<1x256xf32>
    %239 = arith.addf %235, %238 : vector<1x256xf32>
    %c37 = arith.constant 37 : index
    %240 = memref.load %arg3[%c37] : memref<50xf32, #tpu.memory_space<smem>>
    %241 = vector.broadcast %240 : f32 to vector<1x256xf32>
    %242 = arith.mulf %4, %241 : vector<1x256xf32>
    %243 = arith.addf %239, %242 : vector<1x256xf32>
    %cst_58 = arith.constant 0.000000e+00 : f32
    %244 = vector.broadcast %cst_58 : f32 to vector<1x1xf32>
    %245 = vector.extract_strided_slice %1 {offsets = [0, 1], sizes = [1, 255], strides = [1, 1]} : vector<1x256xf32> to vector<1x255xf32>
    %246 = tpu.concatenate %245, %244 in 1 : vector<1x255xf32>, vector<1x1xf32> -> vector<1x256xf32>
    %cst_59 = arith.constant 0.000000e+00 : f32
    %247 = vector.broadcast %cst_59 : f32 to vector<1x1xf32>
    %248 = vector.extract_strided_slice %4 {offsets = [0, 1], sizes = [1, 255], strides = [1, 1]} : vector<1x256xf32> to vector<1x255xf32>
    %249 = tpu.concatenate %248, %247 in 1 : vector<1x255xf32>, vector<1x1xf32> -> vector<1x256xf32>
    %c15_i32_60 = arith.constant 15 : i32
    %250 = vector.broadcast %c15_i32_60 : i32 to vector<1x256xi32>
    %251 = arith.cmpi slt, %5, %250 : vector<1x256xi32>
    %cst_61 = arith.constant 0.000000e+00 : f32
    %252 = vector.broadcast %cst_61 : f32 to vector<1x256xf32>
    %253 = arith.select %251, %246, %252 : vector<1x256xi1>, vector<1x256xf32>
    %cst_62 = arith.constant 0.000000e+00 : f32
    %254 = vector.broadcast %cst_62 : f32 to vector<1x256xf32>
    %255 = arith.select %251, %249, %254 : vector<1x256xi1>, vector<1x256xf32>
    %c13 = arith.constant 13 : index
    %256 = memref.load %arg3[%c13] : memref<50xf32, #tpu.memory_space<smem>>
    %257 = vector.broadcast %256 : f32 to vector<1x256xf32>
    %258 = arith.mulf %253, %257 : vector<1x256xf32>
    %259 = arith.addf %243, %258 : vector<1x256xf32>
    %c38 = arith.constant 38 : index
    %260 = memref.load %arg3[%c38] : memref<50xf32, #tpu.memory_space<smem>>
    %261 = vector.broadcast %260 : f32 to vector<1x256xf32>
    %262 = arith.mulf %255, %261 : vector<1x256xf32>
    %263 = arith.addf %259, %262 : vector<1x256xf32>
    %cst_63 = arith.constant 0.000000e+00 : f32
    %264 = vector.broadcast %cst_63 : f32 to vector<1x2xf32>
    %265 = vector.extract_strided_slice %1 {offsets = [0, 2], sizes = [1, 254], strides = [1, 1]} : vector<1x256xf32> to vector<1x254xf32>
    %266 = tpu.concatenate %265, %264 in 1 : vector<1x254xf32>, vector<1x2xf32> -> vector<1x256xf32>
    %cst_64 = arith.constant 0.000000e+00 : f32
    %267 = vector.broadcast %cst_64 : f32 to vector<1x2xf32>
    %268 = vector.extract_strided_slice %4 {offsets = [0, 2], sizes = [1, 254], strides = [1, 1]} : vector<1x256xf32> to vector<1x254xf32>
    %269 = tpu.concatenate %268, %267 in 1 : vector<1x254xf32>, vector<1x2xf32> -> vector<1x256xf32>
    %c14_i32_65 = arith.constant 14 : i32
    %270 = vector.broadcast %c14_i32_65 : i32 to vector<1x256xi32>
    %271 = arith.cmpi slt, %5, %270 : vector<1x256xi32>
    %cst_66 = arith.constant 0.000000e+00 : f32
    %272 = vector.broadcast %cst_66 : f32 to vector<1x256xf32>
    %273 = arith.select %271, %266, %272 : vector<1x256xi1>, vector<1x256xf32>
    %cst_67 = arith.constant 0.000000e+00 : f32
    %274 = vector.broadcast %cst_67 : f32 to vector<1x256xf32>
    %275 = arith.select %271, %269, %274 : vector<1x256xi1>, vector<1x256xf32>
    %c14 = arith.constant 14 : index
    %276 = memref.load %arg3[%c14] : memref<50xf32, #tpu.memory_space<smem>>
    %277 = vector.broadcast %276 : f32 to vector<1x256xf32>
    %278 = arith.mulf %273, %277 : vector<1x256xf32>
    %279 = arith.addf %263, %278 : vector<1x256xf32>
    %c39 = arith.constant 39 : index
    %280 = memref.load %arg3[%c39] : memref<50xf32, #tpu.memory_space<smem>>
    %281 = vector.broadcast %280 : f32 to vector<1x256xf32>
    %282 = arith.mulf %275, %281 : vector<1x256xf32>
    %283 = arith.addf %279, %282 : vector<1x256xf32>
    %cst_68 = arith.constant 0.000000e+00 : f32
    %284 = vector.broadcast %cst_68 : f32 to vector<1x14xf32>
    %285 = vector.extract_strided_slice %1 {offsets = [0, 14], sizes = [1, 242], strides = [1, 1]} : vector<1x256xf32> to vector<1x242xf32>
    %286 = tpu.concatenate %285, %284 in 1 : vector<1x242xf32>, vector<1x14xf32> -> vector<1x256xf32>
    %cst_69 = arith.constant 0.000000e+00 : f32
    %287 = vector.broadcast %cst_69 : f32 to vector<1x14xf32>
    %288 = vector.extract_strided_slice %4 {offsets = [0, 14], sizes = [1, 242], strides = [1, 1]} : vector<1x256xf32> to vector<1x242xf32>
    %289 = tpu.concatenate %288, %287 in 1 : vector<1x242xf32>, vector<1x14xf32> -> vector<1x256xf32>
    %c2_i32_70 = arith.constant 2 : i32
    %290 = vector.broadcast %c2_i32_70 : i32 to vector<1x256xi32>
    %291 = arith.cmpi sge, %5, %290 : vector<1x256xi32>
    %cst_71 = arith.constant 0.000000e+00 : f32
    %292 = vector.broadcast %cst_71 : f32 to vector<1x256xf32>
    %293 = arith.select %291, %286, %292 : vector<1x256xi1>, vector<1x256xf32>
    %cst_72 = arith.constant 0.000000e+00 : f32
    %294 = vector.broadcast %cst_72 : f32 to vector<1x256xf32>
    %295 = arith.select %291, %289, %294 : vector<1x256xi1>, vector<1x256xf32>
    %c15 = arith.constant 15 : index
    %296 = memref.load %arg3[%c15] : memref<50xf32, #tpu.memory_space<smem>>
    %297 = vector.broadcast %296 : f32 to vector<1x256xf32>
    %298 = arith.mulf %293, %297 : vector<1x256xf32>
    %299 = arith.addf %283, %298 : vector<1x256xf32>
    %c40 = arith.constant 40 : index
    %300 = memref.load %arg3[%c40] : memref<50xf32, #tpu.memory_space<smem>>
    %301 = vector.broadcast %300 : f32 to vector<1x256xf32>
    %302 = arith.mulf %295, %301 : vector<1x256xf32>
    %303 = arith.addf %299, %302 : vector<1x256xf32>
    %cst_73 = arith.constant 0.000000e+00 : f32
    %304 = vector.broadcast %cst_73 : f32 to vector<1x15xf32>
    %305 = vector.extract_strided_slice %1 {offsets = [0, 15], sizes = [1, 241], strides = [1, 1]} : vector<1x256xf32> to vector<1x241xf32>
    %306 = tpu.concatenate %305, %304 in 1 : vector<1x241xf32>, vector<1x15xf32> -> vector<1x256xf32>
    %cst_74 = arith.constant 0.000000e+00 : f32
    %307 = vector.broadcast %cst_74 : f32 to vector<1x15xf32>
    %308 = vector.extract_strided_slice %4 {offsets = [0, 15], sizes = [1, 241], strides = [1, 1]} : vector<1x256xf32> to vector<1x241xf32>
    %309 = tpu.concatenate %308, %307 in 1 : vector<1x241xf32>, vector<1x15xf32> -> vector<1x256xf32>
    %c1_i32_75 = arith.constant 1 : i32
    %310 = vector.broadcast %c1_i32_75 : i32 to vector<1x256xi32>
    %311 = arith.cmpi sge, %5, %310 : vector<1x256xi32>
    %cst_76 = arith.constant 0.000000e+00 : f32
    %312 = vector.broadcast %cst_76 : f32 to vector<1x256xf32>
    %313 = arith.select %311, %306, %312 : vector<1x256xi1>, vector<1x256xf32>
    %cst_77 = arith.constant 0.000000e+00 : f32
    %314 = vector.broadcast %cst_77 : f32 to vector<1x256xf32>
    %315 = arith.select %311, %309, %314 : vector<1x256xi1>, vector<1x256xf32>
    %c16 = arith.constant 16 : index
    %316 = memref.load %arg3[%c16] : memref<50xf32, #tpu.memory_space<smem>>
    %317 = vector.broadcast %316 : f32 to vector<1x256xf32>
    %318 = arith.mulf %313, %317 : vector<1x256xf32>
    %319 = arith.addf %303, %318 : vector<1x256xf32>
    %c41 = arith.constant 41 : index
    %320 = memref.load %arg3[%c41] : memref<50xf32, #tpu.memory_space<smem>>
    %321 = vector.broadcast %320 : f32 to vector<1x256xf32>
    %322 = arith.mulf %315, %321 : vector<1x256xf32>
    %323 = arith.addf %319, %322 : vector<1x256xf32>
    %cst_78 = arith.constant 0.000000e+00 : f32
    %324 = vector.broadcast %cst_78 : f32 to vector<1x16xf32>
    %325 = vector.extract_strided_slice %1 {offsets = [0, 16], sizes = [1, 240], strides = [1, 1]} : vector<1x256xf32> to vector<1x240xf32>
    %326 = tpu.concatenate %325, %324 in 1 : vector<1x240xf32>, vector<1x16xf32> -> vector<1x256xf32>
    %cst_79 = arith.constant 0.000000e+00 : f32
    %327 = vector.broadcast %cst_79 : f32 to vector<1x16xf32>
    %328 = vector.extract_strided_slice %4 {offsets = [0, 16], sizes = [1, 240], strides = [1, 1]} : vector<1x256xf32> to vector<1x240xf32>
    %329 = tpu.concatenate %328, %327 in 1 : vector<1x240xf32>, vector<1x16xf32> -> vector<1x256xf32>
    %c17 = arith.constant 17 : index
    %330 = memref.load %arg3[%c17] : memref<50xf32, #tpu.memory_space<smem>>
    %331 = vector.broadcast %330 : f32 to vector<1x256xf32>
    %332 = arith.mulf %326, %331 : vector<1x256xf32>
    %333 = arith.addf %323, %332 : vector<1x256xf32>
    %c42 = arith.constant 42 : index
    %334 = memref.load %arg3[%c42] : memref<50xf32, #tpu.memory_space<smem>>
    %335 = vector.broadcast %334 : f32 to vector<1x256xf32>
    %336 = arith.mulf %329, %335 : vector<1x256xf32>
    %337 = arith.addf %333, %336 : vector<1x256xf32>
    %cst_80 = arith.constant 0.000000e+00 : f32
    %338 = vector.broadcast %cst_80 : f32 to vector<1x17xf32>
    %339 = vector.extract_strided_slice %1 {offsets = [0, 17], sizes = [1, 239], strides = [1, 1]} : vector<1x256xf32> to vector<1x239xf32>
    %340 = tpu.concatenate %339, %338 in 1 : vector<1x239xf32>, vector<1x17xf32> -> vector<1x256xf32>
    %cst_81 = arith.constant 0.000000e+00 : f32
    %341 = vector.broadcast %cst_81 : f32 to vector<1x17xf32>
    %342 = vector.extract_strided_slice %4 {offsets = [0, 17], sizes = [1, 239], strides = [1, 1]} : vector<1x256xf32> to vector<1x239xf32>
    %343 = tpu.concatenate %342, %341 in 1 : vector<1x239xf32>, vector<1x17xf32> -> vector<1x256xf32>
    %c15_i32_82 = arith.constant 15 : i32
    %344 = vector.broadcast %c15_i32_82 : i32 to vector<1x256xi32>
    %345 = arith.cmpi slt, %5, %344 : vector<1x256xi32>
    %cst_83 = arith.constant 0.000000e+00 : f32
    %346 = vector.broadcast %cst_83 : f32 to vector<1x256xf32>
    %347 = arith.select %345, %340, %346 : vector<1x256xi1>, vector<1x256xf32>
    %cst_84 = arith.constant 0.000000e+00 : f32
    %348 = vector.broadcast %cst_84 : f32 to vector<1x256xf32>
    %349 = arith.select %345, %343, %348 : vector<1x256xi1>, vector<1x256xf32>
    %c18 = arith.constant 18 : index
    %350 = memref.load %arg3[%c18] : memref<50xf32, #tpu.memory_space<smem>>
    %351 = vector.broadcast %350 : f32 to vector<1x256xf32>
    %352 = arith.mulf %347, %351 : vector<1x256xf32>
    %353 = arith.addf %337, %352 : vector<1x256xf32>
    %c43 = arith.constant 43 : index
    %354 = memref.load %arg3[%c43] : memref<50xf32, #tpu.memory_space<smem>>
    %355 = vector.broadcast %354 : f32 to vector<1x256xf32>
    %356 = arith.mulf %349, %355 : vector<1x256xf32>
    %357 = arith.addf %353, %356 : vector<1x256xf32>
    %cst_85 = arith.constant 0.000000e+00 : f32
    %358 = vector.broadcast %cst_85 : f32 to vector<1x18xf32>
    %359 = vector.extract_strided_slice %1 {offsets = [0, 18], sizes = [1, 238], strides = [1, 1]} : vector<1x256xf32> to vector<1x238xf32>
    %360 = tpu.concatenate %359, %358 in 1 : vector<1x238xf32>, vector<1x18xf32> -> vector<1x256xf32>
    %cst_86 = arith.constant 0.000000e+00 : f32
    %361 = vector.broadcast %cst_86 : f32 to vector<1x18xf32>
    %362 = vector.extract_strided_slice %4 {offsets = [0, 18], sizes = [1, 238], strides = [1, 1]} : vector<1x256xf32> to vector<1x238xf32>
    %363 = tpu.concatenate %362, %361 in 1 : vector<1x238xf32>, vector<1x18xf32> -> vector<1x256xf32>
    %c14_i32_87 = arith.constant 14 : i32
    %364 = vector.broadcast %c14_i32_87 : i32 to vector<1x256xi32>
    %365 = arith.cmpi slt, %5, %364 : vector<1x256xi32>
    %cst_88 = arith.constant 0.000000e+00 : f32
    %366 = vector.broadcast %cst_88 : f32 to vector<1x256xf32>
    %367 = arith.select %365, %360, %366 : vector<1x256xi1>, vector<1x256xf32>
    %cst_89 = arith.constant 0.000000e+00 : f32
    %368 = vector.broadcast %cst_89 : f32 to vector<1x256xf32>
    %369 = arith.select %365, %363, %368 : vector<1x256xi1>, vector<1x256xf32>
    %c19 = arith.constant 19 : index
    %370 = memref.load %arg3[%c19] : memref<50xf32, #tpu.memory_space<smem>>
    %371 = vector.broadcast %370 : f32 to vector<1x256xf32>
    %372 = arith.mulf %367, %371 : vector<1x256xf32>
    %373 = arith.addf %357, %372 : vector<1x256xf32>
    %c44 = arith.constant 44 : index
    %374 = memref.load %arg3[%c44] : memref<50xf32, #tpu.memory_space<smem>>
    %375 = vector.broadcast %374 : f32 to vector<1x256xf32>
    %376 = arith.mulf %369, %375 : vector<1x256xf32>
    %377 = arith.addf %373, %376 : vector<1x256xf32>
    %cst_90 = arith.constant 0.000000e+00 : f32
    %378 = vector.broadcast %cst_90 : f32 to vector<1x30xf32>
    %379 = vector.extract_strided_slice %1 {offsets = [0, 30], sizes = [1, 226], strides = [1, 1]} : vector<1x256xf32> to vector<1x226xf32>
    %380 = tpu.concatenate %379, %378 in 1 : vector<1x226xf32>, vector<1x30xf32> -> vector<1x256xf32>
    %cst_91 = arith.constant 0.000000e+00 : f32
    %381 = vector.broadcast %cst_91 : f32 to vector<1x30xf32>
    %382 = vector.extract_strided_slice %4 {offsets = [0, 30], sizes = [1, 226], strides = [1, 1]} : vector<1x256xf32> to vector<1x226xf32>
    %383 = tpu.concatenate %382, %381 in 1 : vector<1x226xf32>, vector<1x30xf32> -> vector<1x256xf32>
    %c2_i32_92 = arith.constant 2 : i32
    %384 = vector.broadcast %c2_i32_92 : i32 to vector<1x256xi32>
    %385 = arith.cmpi sge, %5, %384 : vector<1x256xi32>
    %cst_93 = arith.constant 0.000000e+00 : f32
    %386 = vector.broadcast %cst_93 : f32 to vector<1x256xf32>
    %387 = arith.select %385, %380, %386 : vector<1x256xi1>, vector<1x256xf32>
    %cst_94 = arith.constant 0.000000e+00 : f32
    %388 = vector.broadcast %cst_94 : f32 to vector<1x256xf32>
    %389 = arith.select %385, %383, %388 : vector<1x256xi1>, vector<1x256xf32>
    %c20 = arith.constant 20 : index
    %390 = memref.load %arg3[%c20] : memref<50xf32, #tpu.memory_space<smem>>
    %391 = vector.broadcast %390 : f32 to vector<1x256xf32>
    %392 = arith.mulf %387, %391 : vector<1x256xf32>
    %393 = arith.addf %377, %392 : vector<1x256xf32>
    %c45 = arith.constant 45 : index
    %394 = memref.load %arg3[%c45] : memref<50xf32, #tpu.memory_space<smem>>
    %395 = vector.broadcast %394 : f32 to vector<1x256xf32>
    %396 = arith.mulf %389, %395 : vector<1x256xf32>
    %397 = arith.addf %393, %396 : vector<1x256xf32>
    %cst_95 = arith.constant 0.000000e+00 : f32
    %398 = vector.broadcast %cst_95 : f32 to vector<1x31xf32>
    %399 = vector.extract_strided_slice %1 {offsets = [0, 31], sizes = [1, 225], strides = [1, 1]} : vector<1x256xf32> to vector<1x225xf32>
    %400 = tpu.concatenate %399, %398 in 1 : vector<1x225xf32>, vector<1x31xf32> -> vector<1x256xf32>
    %cst_96 = arith.constant 0.000000e+00 : f32
    %401 = vector.broadcast %cst_96 : f32 to vector<1x31xf32>
    %402 = vector.extract_strided_slice %4 {offsets = [0, 31], sizes = [1, 225], strides = [1, 1]} : vector<1x256xf32> to vector<1x225xf32>
    %403 = tpu.concatenate %402, %401 in 1 : vector<1x225xf32>, vector<1x31xf32> -> vector<1x256xf32>
    %c1_i32_97 = arith.constant 1 : i32
    %404 = vector.broadcast %c1_i32_97 : i32 to vector<1x256xi32>
    %405 = arith.cmpi sge, %5, %404 : vector<1x256xi32>
    %cst_98 = arith.constant 0.000000e+00 : f32
    %406 = vector.broadcast %cst_98 : f32 to vector<1x256xf32>
    %407 = arith.select %405, %400, %406 : vector<1x256xi1>, vector<1x256xf32>
    %cst_99 = arith.constant 0.000000e+00 : f32
    %408 = vector.broadcast %cst_99 : f32 to vector<1x256xf32>
    %409 = arith.select %405, %403, %408 : vector<1x256xi1>, vector<1x256xf32>
    %c21 = arith.constant 21 : index
    %410 = memref.load %arg3[%c21] : memref<50xf32, #tpu.memory_space<smem>>
    %411 = vector.broadcast %410 : f32 to vector<1x256xf32>
    %412 = arith.mulf %407, %411 : vector<1x256xf32>
    %413 = arith.addf %397, %412 : vector<1x256xf32>
    %c46 = arith.constant 46 : index
    %414 = memref.load %arg3[%c46] : memref<50xf32, #tpu.memory_space<smem>>
    %415 = vector.broadcast %414 : f32 to vector<1x256xf32>
    %416 = arith.mulf %409, %415 : vector<1x256xf32>
    %417 = arith.addf %413, %416 : vector<1x256xf32>
    %cst_100 = arith.constant 0.000000e+00 : f32
    %418 = vector.broadcast %cst_100 : f32 to vector<1x32xf32>
    %419 = vector.extract_strided_slice %1 {offsets = [0, 32], sizes = [1, 224], strides = [1, 1]} : vector<1x256xf32> to vector<1x224xf32>
    %420 = tpu.concatenate %419, %418 in 1 : vector<1x224xf32>, vector<1x32xf32> -> vector<1x256xf32>
    %cst_101 = arith.constant 0.000000e+00 : f32
    %421 = vector.broadcast %cst_101 : f32 to vector<1x32xf32>
    %422 = vector.extract_strided_slice %4 {offsets = [0, 32], sizes = [1, 224], strides = [1, 1]} : vector<1x256xf32> to vector<1x224xf32>
    %423 = tpu.concatenate %422, %421 in 1 : vector<1x224xf32>, vector<1x32xf32> -> vector<1x256xf32>
    %c22 = arith.constant 22 : index
    %424 = memref.load %arg3[%c22] : memref<50xf32, #tpu.memory_space<smem>>
    %425 = vector.broadcast %424 : f32 to vector<1x256xf32>
    %426 = arith.mulf %420, %425 : vector<1x256xf32>
    %427 = arith.addf %417, %426 : vector<1x256xf32>
    %c47 = arith.constant 47 : index
    %428 = memref.load %arg3[%c47] : memref<50xf32, #tpu.memory_space<smem>>
    %429 = vector.broadcast %428 : f32 to vector<1x256xf32>
    %430 = arith.mulf %423, %429 : vector<1x256xf32>
    %431 = arith.addf %427, %430 : vector<1x256xf32>
    %cst_102 = arith.constant 0.000000e+00 : f32
    %432 = vector.broadcast %cst_102 : f32 to vector<1x33xf32>
    %433 = vector.extract_strided_slice %1 {offsets = [0, 33], sizes = [1, 223], strides = [1, 1]} : vector<1x256xf32> to vector<1x223xf32>
    %434 = tpu.concatenate %433, %432 in 1 : vector<1x223xf32>, vector<1x33xf32> -> vector<1x256xf32>
    %cst_103 = arith.constant 0.000000e+00 : f32
    %435 = vector.broadcast %cst_103 : f32 to vector<1x33xf32>
    %436 = vector.extract_strided_slice %4 {offsets = [0, 33], sizes = [1, 223], strides = [1, 1]} : vector<1x256xf32> to vector<1x223xf32>
    %437 = tpu.concatenate %436, %435 in 1 : vector<1x223xf32>, vector<1x33xf32> -> vector<1x256xf32>
    %c15_i32_104 = arith.constant 15 : i32
    %438 = vector.broadcast %c15_i32_104 : i32 to vector<1x256xi32>
    %439 = arith.cmpi slt, %5, %438 : vector<1x256xi32>
    %cst_105 = arith.constant 0.000000e+00 : f32
    %440 = vector.broadcast %cst_105 : f32 to vector<1x256xf32>
    %441 = arith.select %439, %434, %440 : vector<1x256xi1>, vector<1x256xf32>
    %cst_106 = arith.constant 0.000000e+00 : f32
    %442 = vector.broadcast %cst_106 : f32 to vector<1x256xf32>
    %443 = arith.select %439, %437, %442 : vector<1x256xi1>, vector<1x256xf32>
    %c23 = arith.constant 23 : index
    %444 = memref.load %arg3[%c23] : memref<50xf32, #tpu.memory_space<smem>>
    %445 = vector.broadcast %444 : f32 to vector<1x256xf32>
    %446 = arith.mulf %441, %445 : vector<1x256xf32>
    %447 = arith.addf %431, %446 : vector<1x256xf32>
    %c48 = arith.constant 48 : index
    %448 = memref.load %arg3[%c48] : memref<50xf32, #tpu.memory_space<smem>>
    %449 = vector.broadcast %448 : f32 to vector<1x256xf32>
    %450 = arith.mulf %443, %449 : vector<1x256xf32>
    %451 = arith.addf %447, %450 : vector<1x256xf32>
    %cst_107 = arith.constant 0.000000e+00 : f32
    %452 = vector.broadcast %cst_107 : f32 to vector<1x34xf32>
    %453 = vector.extract_strided_slice %1 {offsets = [0, 34], sizes = [1, 222], strides = [1, 1]} : vector<1x256xf32> to vector<1x222xf32>
    %454 = tpu.concatenate %453, %452 in 1 : vector<1x222xf32>, vector<1x34xf32> -> vector<1x256xf32>
    %cst_108 = arith.constant 0.000000e+00 : f32
    %455 = vector.broadcast %cst_108 : f32 to vector<1x34xf32>
    %456 = vector.extract_strided_slice %4 {offsets = [0, 34], sizes = [1, 222], strides = [1, 1]} : vector<1x256xf32> to vector<1x222xf32>
    %457 = tpu.concatenate %456, %455 in 1 : vector<1x222xf32>, vector<1x34xf32> -> vector<1x256xf32>
    %c14_i32_109 = arith.constant 14 : i32
    %458 = vector.broadcast %c14_i32_109 : i32 to vector<1x256xi32>
    %459 = arith.cmpi slt, %5, %458 : vector<1x256xi32>
    %cst_110 = arith.constant 0.000000e+00 : f32
    %460 = vector.broadcast %cst_110 : f32 to vector<1x256xf32>
    %461 = arith.select %459, %454, %460 : vector<1x256xi1>, vector<1x256xf32>
    %cst_111 = arith.constant 0.000000e+00 : f32
    %462 = vector.broadcast %cst_111 : f32 to vector<1x256xf32>
    %463 = arith.select %459, %457, %462 : vector<1x256xi1>, vector<1x256xf32>
    %c24 = arith.constant 24 : index
    %464 = memref.load %arg3[%c24] : memref<50xf32, #tpu.memory_space<smem>>
    %465 = vector.broadcast %464 : f32 to vector<1x256xf32>
    %466 = arith.mulf %461, %465 : vector<1x256xf32>
    %467 = arith.addf %451, %466 : vector<1x256xf32>
    %c49 = arith.constant 49 : index
    %468 = memref.load %arg3[%c49] : memref<50xf32, #tpu.memory_space<smem>>
    %469 = vector.broadcast %468 : f32 to vector<1x256xf32>
    %470 = arith.mulf %463, %469 : vector<1x256xf32>
    %471 = arith.addf %467, %470 : vector<1x256xf32>
    %472 = arith.negf %471 : vector<1x256xf32>
    %473 = math.exp %472 : vector<1x256xf32>
    %cst_112 = arith.constant 1.000000e+00 : f32
    %474 = vector.broadcast %cst_112 : f32 to vector<1x256xf32>
    %475 = arith.addf %474, %473 : vector<1x256xf32>
    %476 = arith.divf %474, %475 : vector<1x256xf32>
    %477 = vector.shape_cast %476 : vector<1x256xf32> to vector<1x1x256xf32>
    %478 = vector.broadcast %477 : vector<1x1x256xf32> to vector<1x4x256xf32>
    %479 = arith.mulf %0, %478 : vector<1x4x256xf32>
    %c0_113 = arith.constant 0 : index
    %c0_114 = arith.constant 0 : index
    %c0_115 = arith.constant 0 : index
    %480 = vector.load %arg5[%c0_113, %c0_114, %c0_115] : memref<1x4x256xf32, #tpu.memory_space<vmem>>, vector<1x4x256xf32>
    tpu.vector_store %arg5[%c0_113, %c0_114, %c0_115], %479 {strides = array<i32>} : memref<1x4x256xf32, #tpu.memory_space<vmem>>, vector<1x4x256xf32>,
    return
  }
  func.func @transform_0(%arg0: i32) -> (i32, i32, i32) {
    %c0_i32 = arith.constant 0 : i32
    %c0_i32_0 = arith.constant 0 : i32
    %c0_i32_1 = arith.constant 0 : i32
    return %arg0, %c0_i32, %c0_i32_0 : i32, i32, i32
  }
  func.func @transform_1(%arg0: i32) -> (i32, i32) {
    %c0_i32 = arith.constant 0 : i32
    %c0_i32_0 = arith.constant 0 : i32
    %c0_i32_1 = arith.constant 0 : i32
    return %c0_i32, %c0_i32_0 : i32, i32
  }
  func.func @transform_2(%arg0: i32) -> i32 {
    %c0_i32 = arith.constant 0 : i32
    %c0_i32_0 = arith.constant 0 : i32
    return %c0_i32 : i32
  }
  func.func @transform_3(%arg0: i32) -> i32 {
    %c0_i32 = arith.constant 0 : i32
    %c0_i32_0 = arith.constant 0 : i32
    return %c0_i32 : i32
  }
  func.func @transform_4(%arg0: i32) -> (i32, i32, i32) {
    %c0_i32 = arith.constant 0 : i32
    %c0_i32_0 = arith.constant 0 : i32
    %c0_i32_1 = arith.constant 0 : i32
    return %arg0, %c0_i32, %c0_i32_0 : i32, i32, i32
  }
}

</mosaic_0001>

<bundles_post_ra>
// kernel: tpu_custom_call.1
= control target key start
LH: loop header
LB: loop body
LE: loop exit
PB: predicated region body
PF: predicated region fallthrough
CT: control target
= control target key end

     0   :  { %s2962_s0 = inlined_call_operand.hbm [shape: f32[2,4,256], index: 0, kind: input, shape index: {}]   ;;  %s2963_s1 = inlined_call_operand.vmem [shape: s32[1,256], index: 1, kind: input, shape index: {}]   ;;  %s2964_s2 = inlined_call_operand.vmem [shape: f32[50], index: 2, kind: input, shape index: {}]   ;;  %s2965_s3 = inlined_call_operand.<no memory space> [shape: f32[1], index: 3, kind: input, shape index: {}]   ;;  %s2966_s4 = inlined_call_operand.hbm [shape: f32[2,4,256], index: 4, kind: output, shape index: {}]  }
   0x1   :  { %9 = sst [smem:[#allocation2]] %s2965_s3 }
   0x2   :  { %10 = vsyncpa [#allocation4], 0 }
   0x3   :  { %12 = vsyncpa [#allocation4 + $0x1], 0 }
   0x4   :  { %13 = vsyncpa [#allocation6], 0 }
   0x5   :  { %14 = vsyncpa [#allocation5], 0 }
   0x6   :  { %16 = vsyncpa [#allocation5 + $0x1], 0  ;;  %s2195_s17 = smov 0   ;;  %s2197_s18 = smov 0  }
   0x7   :  { %s2199_s19 = smov 0   ;;  %s2201_s20 = smov 0  }
   0x8 LB: > { %s2216_s3 = sadd.s32 4294967295, %s2137_s20   ;;  %s1870_s21 = sadd.s32 4294967294, %s2137_s20   ;;  %s2137_s20 = sphi %s2201_s20, %s2989_s20   ;;  %s2133_s19 = sphi %s2199_s19, %s2988_s19   ;;  %s2129_s18 = sphi %s2197_s18, %s2987_s18   ;;  %s2125_s17 = sphi %s2195_s17, %s2986_s17  }
   0x9   : > { %p42_p0 = scmp.ne.s32.totalorder %s2129_s18, %s2125_s17  ;;  %p2967_p1 = scmp.eq.s32.totalorder %s2216_s3, 0 }
   0xa   : > { %p135_p3 = scmp.eq.s32.totalorder %s1870_s21, 1  ;;  %p1871_p5 = scmp.ge.s32.totalorder %s2137_s20, 1 }
   0xb   : > { %p2225_p4 = por %p2967_p1, %p42_p0  ;;  %p142_p7 = scmp.lt.s32.totalorder %s2137_s20, 3 }
   0xc   : > { %p2230_p6 = por %p135_p3, %p42_p0  ;;  %s158_s26 = sshll.u32 %s2964_s2, 4  ;;  %s159_s26 = int_to_ptr.vmem [resolvable:$true] %s158_s26 }
   0xd   : > { %s2971_s22 = scalar_select %p2225_p4, 1, 0 }
   0xe   : > { %s2972_s23 = scalar_select %p2230_p6, 1, 0 }
   0xf   : > { %p2238_p8 = pnand %p1871_p5, %p142_p7  ;;  %s2246_s28 = sadd.s32 1, %s2137_s20  }
  0x10   : > { %s26_s30 = ssub.s32 %s2137_s20, %s2246_s28  ;;  %s29_s6 = sadd.s32 1, %s2133_s19 }
  0x11   : > { %s2973_s27 = scalar_select %p2238_p8, 1, 0 }
  0x12   : > { %p1946_p10 = pneg %p2238_p8  ;;  %p2256_p12 = scmp.eq.s32.totalorder %s26_s30, 0 }
  0x13   : > { %p36_p13 = scmp.ne.s32.totalorder %s2133_s19, %s2129_s18  ;;  %s2026_s7 = scalar_lea.vmem %s159_s26, 16 }
  0x14   : > { %p2250_p11 = pnand %p1946_p10, %p2967_p1  ;;  %p2027_p0 = scmp.ne.s32.totalorder %s159_s26, %s2026_s7 }
  0x15   : > { %p2034_p9 = scmp.lt.s32.totalorder %s159_s26, %s159_s26  ;;  %p2035_p2 = scmp.lt.s32.totalorder %s2026_s7, %s2026_s7 }
  0x16   : > { %p2028_p3 = pneg %p2250_p11 }
  0x17   : > { %p2036_p10 = por %p2035_p2, %p2034_p9 }
  0x18   : > { %p2029_p5 = pnand %p2028_p3, %p2027_p0 }
  0x1a   : > { %p2030_p7 = pneg %p2029_p5 }
  0x1c   : > { %p2037_p1 = pnand %p2036_p10, %p2030_p7 }
  0x1e   : > { %2040 = shalt.err (!%p2037_p1)
}
  0x1f   : > { %s2139_s8 = smov [#allocation7]   ;;  %p37_p2 = scmp.eq.s32.totalorder %s2137_s20, 0 }
  0x20   : > { %1949 = dma.vmem_to_smem (!%p2250_p11), %s159_s26, 16, %s2139_s8, [#allocation6]  }
  0x21   : > { %s2270_s9 = scalar_select %p2256_p12, %s2133_s19, %s29_s6  }
  0x22   : > { %p2976_p1 = scmp.eq.s32.totalorder %s2216_s3, 1  ;;  %p1959_p0 = scmp.lt.s32.totalorder %s2137_s20, 2 }
  0x23   : > { %s172_s11 = sand.u32 1, %s2133_s19   ;;  %p38_p3 = por %p37_p2, %p36_p13 }
  0x24   : > { %p2278_p9 = por %p2976_p1, %p36_p13  ;;  %s1874_s12 = sshll.u32 %s172_s11, 3 }
  0x25   : > { %s1936_s13 = sshll.u32 %s2137_s20, 7  ;;  %s176_s21 = scalar_lea.vmem [#allocation3], %s1874_s12 }
  0x26   : > { %s2977_s10 = scalar_select %p2278_p9, 1, 0 }
  0x27   : > { %s2291_s16 = scalar_lea.hbm %s2962_s0, %s1936_s13  ;;  %s184_s24 = sshll.u32 %s176_s21, 4  ;;  %s185_s24 = int_to_ptr.vmem [resolvable:$true] %s184_s24 }
  0x28   : > { %p2293_p11 = pnand %p1959_p0, %p38_p3  ;;  %s173_s26 = scalar_lea.sflag [#allocation4], %s172_s11 }
  0x29   : > { %s2041_s29 = scalar_lea.hbm %s2291_s16, 128  ;;  %s2046_s6 = scalar_lea.hbm %s2962_s0, 256 }
  0x2a   : > { %p2042_p12 = scmp.ne.s32.totalorder %s2291_s16, %s2041_s29  ;;  %p2043_p13 = pneg %p2293_p11 }
  0x2b   : > { %p2047_p10 = scmp.lt.s32.totalorder %s2291_s16, %s2962_s0  ;;  %p2048_p2 = scmp.lt.s32.totalorder %s2046_s6, %s2041_s29 }
  0x2c   : > { %p2044_p5 = pnand %p2043_p13, %p2042_p12 }
  0x2d   : > { %p2049_p1 = por %p2048_p2, %p2047_p10 }
  0x2e   : > { %p2045_p7 = pneg %p2044_p5 }
  0x30   : > { %p2050_p0 = pnand %p2049_p1, %p2045_p7 }
  0x32   : > { %2053 = shalt.err (!%p2050_p0)
}
  0x33   : > { %s2054_s12 = scalar_lea.vmem %s185_s24, 128  ;;  %s2140_s11 = smov [#allocation3]  }
  0x34   : > { %p2055_p3 = scmp.ne.s32.totalorder %s185_s24, %s2054_s12  ;;  %s2059_s13 = sshll.u32 %s2140_s11, 4  ;;  %s2060_s13 = int_to_ptr.vmem [resolvable:$false] %s2059_s13 }
  0x35   : > { %s2061_s14 = scalar_lea.vmem %s2060_s13, 256  ;;  %p2062_p12 = scmp.lt.s32.totalorder %s185_s24, %s2060_s13 }
  0x36   : > { %p2057_p6 = pnand %p2055_p3, %p2043_p13  ;;  %p2063_p5 = scmp.lt.s32.totalorder %s2061_s14, %s2054_s12 }
  0x38   : > { %p2058_p9 = pneg %p2057_p6  ;;  %p2064_p4 = por %p2063_p5, %p2062_p12 }
  0x3a   : > { %p2065_p8 = pnand %p2064_p4, %p2058_p9 }
  0x3c   : > { %2068 = shalt.err (!%p2065_p8)
}
  0x3d   : > { %1953 = dma.hbm_to_vmem [thread:$0]  (!%p2293_p11), %s2291_s16, 128, %s185_s24, %s173_s26  }
  0x3e   : > { %p2979_p7 = scmp.ne.s32.totalorder %s2973_s27, 0 }
  0x3f   : > { %s2314_s15 = sand.u32 (!%p2979_p7), 1, %s2129_s18   ;;  %p2980_p4 = scmp.ne.s32.totalorder (!%p2979_p7), %s2971_s22, 0 }
  0x40   : > { %193 = sbr.rel (%p2979_p7) target bundleno = 458 (0x1ca), region = 36  ;;  %s1878_s21 = sshll.u32 (!%p2979_p7), %s2314_s15, 3 }
  0x41   : > { %s196_s29 = scalar_lea.sflag (!%p2979_p7), [#allocation4], %s2314_s15  ;;  %s2320_s30 = scalar_lea.vmem (!%p2979_p7), [#allocation3], %s1878_s21 }
  0x45   : > { %2112 = dma.done.wait (%p2980_p4), %s196_s29, 128  }
  0x46   : > { %2114 = vsyncadd (%p2980_p4), %s196_s29, 4294967168  ;;  %p2981_p6 = scmp.eq.s32.totalorder %s2216_s3, 0 }
  0x48   : > { %2116 = dma.done.wait (%p2981_p6), [#allocation6], 16   ;;  %p2982_p8 = pmov %p2981_p6 }
  0x4a   : > { %2118 = vsyncadd (%p2982_p8), [#allocation6], 4294967280 }
  0x4b   : > { %208 = sfence }
  0x4c   : > { %v229_v0 = vld [vmem:[%s2320_s30] sm:$0xff]  ;;  %vm233_vm0 = vcmask 1043456   ;;  %s2141_s22 = smov 34   ;;  %s2142_s27 = smov 33   ;;  %vm336_vm1 = vcmask 269312   ;;  %v293_v36 = vlaneseq  ;;  %vm396_vm2 = vcmask 261120  }
  0x4d   : > { %v234_v1 = vsel %vm233_vm0, %v229_v0, -inf  ;;  %v248_v2 = vsel %vm233_vm0, %v229_v0, 0.0  ;;  %v231_v3 = vcombine.high %v229_v0, %v229_v0  ;;  %s2143_s16 = smov 32   ;;  %s2144_s24 = smov 31   ;;  %v2156_v34 = vmov 1966171168  }
  0x4e   : > { %v235_v4 = vrot.slane %v234_v1, 4  ;;  %v249_v5 = vrot.slane %v248_v2, 4  ;;  %s2145_s25 = smov 30   ;;  %s2146_s26 = smov 18   ;;  %v291_v35 = vunpack.c.l.s4 %v2156_v34  ;;  %v2402_v40 = vshrl.u32 %v293_v36, 7 }
  0x4f   : > { %v241_v6 = vsel %vm233_vm0, %v231_v3, -inf  ;;  %v255_v7 = vsel %vm233_vm0, %v231_v3, 0.0  ;;  %s2147_s5 = smov 17   ;;  %s2148_s6 = smov 16   ;;  %vm274_vm3 = vcmask 277504   ;;  %vm459_vm6 = vcmask 252928  }
  0x50   : > { %v236_v8 = vmax.f32 %v234_v1, %v235_v4  ;;  %v250_v9 = vadd.f32 %v249_v5, %v248_v2  ;;  %v242_v10 = vrot.slane %v241_v6, 4  ;;  %v256_v11 = vrot.slane %v255_v7, 4  ;;  %s2149_s7 = smov 15   ;;  %s2150_s8 = smov 14   ;;  %v2437_v61 = vld [vmem:[%s2963_s1] sm:$0x3] }
  0x51   : > { %s2151_s12 = smov 2   ;;  %s2152_s11 = smov 1   ;;  %v292_v39 = vunpack.c.0.s8 %v291_v35  ;;  %vm287_vm4 = vcmp.ge.s32.totalorder %v2437_v61, 2  ;;  %vm347_vm5 = vcmp.ge.s32.totalorder %v2437_v61, 1  ;;  %vm519_vm7 = vcmask 244736  }
  0x52   : > { %v237_v12 = vrot.slane %v236_v8, 2  ;;  %v251_v13 = vrot.slane %v250_v9, 2  ;;  %v243_v14 = vmax.f32 %v241_v6, %v242_v10  ;;  %v257_v15 = vadd.f32 %v256_v11, %v255_v7  ;;  %s2153_s13 = smov 127   ;;  %s2154_s14 = smov 126  }
  0x53   : > { %s2155_s29 = smov 114   ;;  %v2412_v47 = vsub.s32 %v292_v39, %v2402_v40  ;;  %vm470_vm8 = vcmp.lt.s32.totalorder %v2437_v61, 15  ;;  %vm579_vm9 = vcmask 146432   ;;  %vm530_vm10 = vcmp.lt.s32.totalorder %v2437_v61, 14  ;;  %p2983_p11 = scmp.ne.s32.totalorder %s2977_s10, 0 }
  0x54   : > { %v238_v16 = vmax.f32 %v236_v8, %v237_v12  ;;  %v252_v17 = vadd.f32 %v251_v13, %v250_v9  ;;  %v244_v18 = vrot.slane %v243_v14, 2  ;;  %v258_v19 = vrot.slane %v257_v15, 2 }
  0x55   : > { %vm638_vm11 = vcmask 138240   ;;  %vm697_vm12 = vcmask 130048   ;;  %vm760_vm13 = vcmask 121856   ;;  %vm819_vm14 = vcmask 113664  }
  0x56   : > { %v239_v20 = vrot.slane %v238_v16, 1  ;;  %v253_v21 = vrot.slane %v252_v17, 1  ;;  %v245_v22 = vmax.f32 %v243_v14, %v244_v18  ;;  %v259_v26 = vadd.f32 %v258_v19, %v257_v15 }
  0x57   : > { %vm878_vm15 = vcmask 15360   ;;  %vm937_vm0 = vcmask 7168  }
  0x58   : > { %v2331_v23 = vmax.f32 %v238_v16, %v239_v20  ;;  %v254_v24 = vadd.f32 %v253_v21, %v252_v17  ;;  %v246_v25 = vrot.slane %v245_v22, 1  ;;  %v260_v29 = vrot.slane %v259_v26, 1 }
  0x5a   : > { %270 = vrot.lane.b32.xlu0 %v2331_v23, %s2141_s22  ;;  %v2334_v27 = vmul.f32 0.25, %v254_v24  ;;  %v2337_v28 = vmax.f32 %v245_v22, %v246_v25  ;;  %v261_v30 = vadd.f32 %v260_v29, %v259_v26 }
  0x5c   : > { %280 = vrot.lane.b32.xlu1 %v2334_v27, %s2141_s22  ;;  %v2343_v31 = vmul.f32 0.25, %v261_v30 }
  0x5e   : > { %332 = vrot.lane.b32.xlu0 %v2331_v23, %s2142_s27 }
  0x60   : > { %334 = vrot.lane.b32.xlu1 %v2337_v28, %s2142_s27 }
  0x62   : > { %392 = vrot.lane.b32.xlu0 %v2331_v23, %s2143_s16 }
  0x64   : > { %394 = vrot.lane.b32.xlu1 %v2337_v28, %s2143_s16 }
  0x66   : > { %272 = vrot.lane.b32.xlu0 %v2337_v28, %s2141_s22 }
  0x68   : > { %282 = vrot.lane.b32.xlu1 %v2343_v31, %s2141_s22  ;;  %s2396_s22 = sld [smem:[#allocation7 + $0x2]] }
  0x6a   : > { %340 = vrot.lane.b32.xlu0 %v2334_v27, %s2142_s27 }
  0x6c   : > { %342 = vrot.lane.b32.xlu1 %v2343_v31, %s2142_s27  ;;  %s2157_s27 = smov 113  }
  0x6e   : > { %401 = vrot.lane.b32.xlu0 %v2334_v27, %s2143_s16  ;;  %v410_v43 = vstv %s2396_s22  ;;  %s2493_s22 = sld [smem:[#allocation7 + $0x4]] }
  0x70   : > { %403 = vrot.lane.b32.xlu1 %v2343_v31, %s2143_s16  ;;  %s2409_s16 = sld [smem:[#allocation7]] }
  0x72   : > { %455 = vrot.lane.b32.xlu0 %v2331_v23, %s2144_s24 }
  0x74   : > { %457 = vrot.lane.b32.xlu1 %v2337_v28, %s2144_s24 }
  0x76   : > { %463 = vrot.lane.b32.xlu0 %v2334_v27, %s2144_s24  ;;  %v325_v3 = vstv %s2409_s16  ;;  %s2161_s16 = smov 98  }
  0x78   : > { %465 = vrot.lane.b32.xlu1 %v2343_v31, %s2144_s24  ;;  %s2417_s24 = sld [smem:[#allocation2]] }
  0x7a   : > { %515 = vrot.lane.b32.xlu0 %v2331_v23, %s2145_s25 }
  0x7c   : > { %517 = vrot.lane.b32.xlu1 %v2337_v28, %s2145_s25 }
  0x7e   : > { %523 = vrot.lane.b32.xlu0 %v2334_v27, %s2145_s25  ;;  %v267_v7 = vstv %s2417_s24  ;;  %s2516_s24 = sld [smem:[#allocation7 + $0x5]] }
  0x80   : > { %525 = vrot.lane.b32.xlu1 %v2343_v31, %s2145_s25  ;;  %s2420_s25 = sld [smem:[#allocation7 + $0x1b]] }
  0x82   : > { %575 = vrot.lane.b32.xlu0 %v2331_v23, %s2146_s26 }
  0x84   : > { %577 = vrot.lane.b32.xlu1 %v2337_v28, %s2146_s26 }
  0x86   : > { %583 = vrot.lane.b32.xlu0 %v2334_v27, %s2146_s26  ;;  %v433_v9 = vstv %s2420_s25  ;;  %s2527_s25 = sld [smem:[#allocation7 + $0x1e]] }
  0x88   : > { %585 = vrot.lane.b32.xlu1 %v2343_v31, %s2146_s26  ;;  %s2423_s26 = sld [smem:[#allocation7 + $0x19]] }
  0x8a   : > { %634 = vrot.lane.b32.xlu0 %v2331_v23, %s2147_s5 }
  0x8c   : > { %636 = vrot.lane.b32.xlu1 %v2337_v28, %s2147_s5 }
  0x8e   : > { %642 = vrot.lane.b32.xlu0 %v2334_v27, %s2147_s5  ;;  %v329_v11 = vstv %s2423_s26  ;;  %s2162_s26 = smov 97  }
  0x90   : > { %644 = vrot.lane.b32.xlu1 %v2343_v31, %s2147_s5  ;;  %s2426_s5 = sld [smem:[#allocation7 + $0x1]] }
  0x92   : > { %693 = vrot.lane.b32.xlu0 %v2331_v23, %s2148_s6 }
  0x94   : > { %695 = vrot.lane.b32.xlu1 %v2337_v28, %s2148_s6 }
  0x96   : > { %702 = vrot.lane.b32.xlu0 %v2334_v27, %s2148_s6  ;;  %v385_v15 = vstv %s2426_s5  ;;  %s2538_s5 = sld [smem:[#allocation7 + $0x6]] }
  0x98   : > { %704 = vrot.lane.b32.xlu1 %v2343_v31, %s2148_s6  ;;  %s2158_s6 = smov 112  }
  0x9a   : > { %756 = vrot.lane.b32.xlu0 %v2331_v23, %s2149_s7 }
  0x9c   : > { %758 = vrot.lane.b32.xlu1 %v2337_v28, %s2149_s7 }
  0x9e   : > { %764 = vrot.lane.b32.xlu0 %v2334_v27, %s2149_s7 }
  0xa0   : > { %766 = vrot.lane.b32.xlu1 %v2343_v31, %s2149_s7  ;;  %s2163_s7 = smov 96  }
  0xa2   : > { %815 = vrot.lane.b32.xlu0 %v2331_v23, %s2150_s8 }
  0xa4   : > { %817 = vrot.lane.b32.xlu1 %v2337_v28, %s2150_s8 }
  0xa6   : > { %823 = vrot.lane.b32.xlu0 %v2334_v27, %s2150_s8 }
  0xa8   : > { %825 = vrot.lane.b32.xlu1 %v2343_v31, %s2150_s8  ;;  %s2164_s8 = smov 95  }
  0xaa   : > { %874 = vrot.lane.b32.xlu0 %v2331_v23, %s2151_s12 }
  0xac   : > { %876 = vrot.lane.b32.xlu1 %v2337_v28, %s2151_s12 }
  0xae   : > { %882 = vrot.lane.b32.xlu0 %v2334_v27, %s2151_s12 }
  0xb0   : > { %884 = vrot.lane.b32.xlu1 %v2343_v31, %s2151_s12  ;;  %s2441_s12 = sld [smem:[#allocation7 + $0x1a]] }
  0xb2   : > { %933 = vrot.lane.b32.xlu0 %v2331_v23, %s2152_s11 }
  0xb4   : > { %935 = vrot.lane.b32.xlu1 %v2337_v28, %s2152_s11 }
  0xb6   : > { %941 = vrot.lane.b32.xlu0 %v2334_v27, %s2152_s11  ;;  %v389_v29 = vstv %s2441_s12  ;;  %s2165_s12 = smov 94  }
  0xb8   : > { %943 = vrot.lane.b32.xlu1 %v2343_v31, %s2152_s11  ;;  %s2159_s11 = smov 111  }
  0xba   : > { %1038 = vrot.lane.b32.xlu0 %v2331_v23, %s2153_s13 }
  0xbc   : > { %1040 = vrot.lane.b32.xlu1 %v2337_v28, %s2153_s13 }
  0xbe   : > { %1046 = vrot.lane.b32.xlu0 %v2334_v27, %s2153_s13 }
  0xc0   : > { %1048 = vrot.lane.b32.xlu1 %v2343_v31, %s2153_s13  ;;  %s2471_s13 = sld [smem:[#allocation7 + $0x3]] }
  0xc2   : > { %1097 = vrot.lane.b32.xlu0 %v2331_v23, %s2154_s14 }
  0xc4   : > { %1099 = vrot.lane.b32.xlu1 %v2337_v28, %s2154_s14 }
  0xc6   : > { %1105 = vrot.lane.b32.xlu0 %v2334_v27, %s2154_s14 }
  0xc8   : > { %1107 = vrot.lane.b32.xlu1 %v2343_v31, %s2154_s14  ;;  %s2481_s14 = sld [smem:[#allocation7 + $0x1c]] }
  0xca   : > { %1156 = vrot.lane.b32.xlu0 %v2331_v23, %s2155_s29 }
  0xcc   : > { %v271_v32 = vpop.permute.xlu0 %270  ;;  %1158 = vrot.lane.b32.xlu1 %v2337_v28, %s2155_s29 }
  0xcd   : > { %v277_v53 = vsel %vm274_vm3, 0.0, %v271_v32 }
  0xce   : > { %v281_v33 = vpop.permute.xlu1 %280  ;;  %1164 = vrot.lane.b32.xlu0 %v2334_v27, %s2155_s29 }
  0xcf   : > { %v286_v59 = vsel %vm274_vm3, 0.0, %v281_v33 }
  0xd0   : > { %v333_v37 = vpop.permute.xlu0 %332  ;;  %1166 = vrot.lane.b32.xlu1 %v2343_v31, %s2155_s29  ;;  %s2160_s29 = smov 110  }
  0xd1   : > { %v339_v38 = vsel %vm336_vm1, 0.0, %v333_v37 }
  0xd2   : > { %v335_v41 = vpop.permute.xlu1 %334  ;;  %1215 = vrot.lane.b32.xlu0 %v2331_v23, %s2157_s27 }
  0xd3   : > { %v337_v42 = vsel %vm336_vm1, %v333_v37, %v335_v41 }
  0xd4   : > { %v349_v44 = vcombine.low %v339_v38, %v337_v42  ;;  %v393_v45 = vpop.permute.xlu0 %392  ;;  %1217 = vrot.lane.b32.xlu1 %v2337_v28, %s2157_s27 }
  0xd5   : > { %v400_v46 = vsel %vm396_vm2, 0.0, %v393_v45 }
  0xd6   : > { %v2414_v48 = vmul.f32 %v410_v43, %v400_v46  ;;  %v395_v49 = vpop.permute.xlu1 %394  ;;  %1223 = vrot.lane.b32.xlu0 %v2334_v27, %s2157_s27  ;;  %v356_v55 = vrot.slane %v349_v44, %v2412_v47 }
  0xd7   : > { %v397_v50 = vsel %vm396_vm2, %v393_v45, %v395_v49 }
  0xd8   : > { %v412_v51 = vmul.f32 %v410_v43, %v397_v50  ;;  %1225 = vrot.lane.b32.xlu1 %v2343_v31, %s2157_s27  ;;  %v273_v52 = vpop.permute.xlu0 %272  ;;  %v363_v2 = vrot.slane %v356_v55, %v2412_v47  ;;  %s2504_s27 = sld [smem:[#allocation7 + $0x1d]] }
  0xd9   : > { %v275_v54 = vsel %vm274_vm3, %v271_v32, %v273_v52 }
  0xda   : > { %v415_v56 = vcombine.low %v2414_v48, %v412_v51  ;;  %v289_v57 = vcombine.low %v277_v53, %v275_v54  ;;  %v283_v58 = vpop.permute.xlu1 %282  ;;  %1274 = vrot.lane.b32.xlu0 %v2331_v23, %s2158_s6  ;;  %v365_v18 = vsel %vm347_vm5, %v363_v2, 0.0 }
  0xdb   : > { %v284_v60 = vsel %vm274_vm3, %v281_v33, %v283_v58  ;;  %v386_v34 = vmul.f32 %v385_v15, %v365_v18  ;;  %vm1160_vm3 = vcmask 932864  }
  0xdc   : > { %v296_v62 = vrot.slane %v289_v57, %v2412_v47  ;;  %v307_v63 = vcombine.low %v286_v59, %v284_v60  ;;  %1276 = vrot.lane.b32.xlu1 %v2337_v28, %s2158_s6  ;;  %v341_v0 = vpop.permute.xlu0 %340  ;;  %v422_v35 = vrot.slane %v415_v56, %v2412_v47  ;;  %v508_v57 = vstv %s2471_s13  ;;  %s1895_s13 = sld [smem:[#allocation7 + $0x20]] }
  0xdd   : > { %v346_v1 = vsel %vm336_vm1, 0.0, %v341_v0 }
  0xde   : > { %v303_v4 = vrot.slane %v296_v62, %v2412_v47  ;;  %v314_v5 = vrot.slane %v307_v63, %v2412_v47  ;;  %v343_v6 = vpop.permute.xlu1 %342  ;;  %1283 = vrot.lane.b32.xlu0 %v2334_v27, %s2158_s6  ;;  %v429_v49 = vrot.slane %v422_v35, %v2412_v47 }
  0xdf   : > { %v344_v8 = vsel %vm336_vm1, %v341_v0, %v343_v6  ;;  %vm1042_vm1 = vcmask 1039360  }
  0xe0   : > { %v305_v10 = vsel %vm287_vm4, %v303_v4, 0.0  ;;  %v321_v12 = vrot.slane %v314_v5, %v2412_v47  ;;  %v367_v13 = vcombine.low %v346_v1, %v344_v8  ;;  %1285 = vrot.lane.b32.xlu1 %v2343_v31, %s2158_s6  ;;  %v402_v14 = vpop.permute.xlu0 %401  ;;  %v512_v5 = vstv %s2481_s14  ;;  %s2549_s6 = sld [smem:[#allocation7 + $0x1f]] }
  0xe1   : > { %v326_v16 = vmul.f32 %v325_v3, %v305_v10  ;;  %v408_v17 = vsel %vm396_vm2, 0.0, %v402_v14  ;;  %s2589_s14 = sld [smem:[#allocation7 + $0x8]] }
  0xe2   : > { %v323_v19 = vsel %vm287_vm4, %v321_v12, 0.0  ;;  %v374_v20 = vrot.slane %v367_v13, %v2412_v47  ;;  %v404_v21 = vpop.permute.xlu1 %403  ;;  %v434_v22 = vmul.f32 %v433_v9, %v408_v17  ;;  %1337 = vrot.lane.b32.xlu0 %v2331_v23, %s2159_s11 }
  0xe3   : > { %v327_v24 = vadd.f32 %v326_v16, %v267_v7  ;;  %v330_v25 = vmul.f32 %v329_v11, %v323_v19  ;;  %v405_v26 = vsel %vm396_vm2, %v402_v14, %v404_v21  ;;  %v568_v16 = vstv %s2493_s22  ;;  %s2604_s22 = sld [smem:[#allocation7 + $0x9]] }
  0xe4   : > { %v381_v30 = vrot.slane %v374_v20, %v2412_v47  ;;  %v435_v32 = vmul.f32 %v433_v9, %v405_v26  ;;  %1339 = vrot.lane.b32.xlu1 %v2337_v28, %s2159_s11  ;;  %v456_v33 = vpop.permute.xlu0 %455  ;;  %vm1101_vm2 = vcmask 1031168  }
  0xe5   : > { %v331_v36 = vadd.f32 %v330_v25, %v327_v24  ;;  %v462_v37 = vsel %vm459_vm6, 0.0, %v456_v33 }
  0xe6   : > { %v383_v38 = vsel %vm347_vm5, %v381_v30, 0.0  ;;  %v438_v39 = vcombine.low %v434_v22, %v435_v32  ;;  %v458_v41 = vpop.permute.xlu1 %457  ;;  %1345 = vrot.lane.b32.xlu0 %v2334_v27, %s2159_s11  ;;  %v572_v30 = vstv %s2504_s27  ;;  %s2610_s27 = sld [smem:[#allocation7 + $0xc]] }
  0xe7   : > { %v387_v42 = vadd.f32 %v386_v34, %v331_v36  ;;  %v390_v43 = vmul.f32 %v389_v29, %v383_v38  ;;  %v460_v44 = vsel %vm459_vm6, %v456_v33, %v458_v41 }
  0xe8   : > { %v445_v45 = vrot.slane %v438_v39, %v2412_v47  ;;  %v472_v46 = vcombine.low %v462_v37, %v460_v44  ;;  %1347 = vrot.lane.b32.xlu1 %v2343_v31, %s2159_s11  ;;  %v464_v48 = vpop.permute.xlu0 %463  ;;  %s1894_s11 = sld [smem:[#allocation7 + $0x7]] }
  0xe9   : > { %v391_v50 = vadd.f32 %v390_v43, %v387_v42  ;;  %v469_v51 = vsel %vm459_vm6, 0.0, %v464_v48  ;;  %v627_v43 = vstv %s2516_s24  ;;  %s2625_s24 = sld [smem:[#allocation7 + $0xa]] }
  0xea   : > { %v452_v52 = vrot.slane %v445_v45, %v2412_v47  ;;  %v479_v53 = vrot.slane %v472_v46, %v2412_v47  ;;  %v466_v54 = vpop.permute.xlu1 %465  ;;  %1396 = vrot.lane.b32.xlu0 %v2331_v23, %s2160_s29 }
  0xeb   : > { %v431_v55 = vadd.f32 %v429_v49, %v391_v50  ;;  %v467_v56 = vsel %vm459_vm6, %v464_v48, %v466_v54  ;;  %vm1219_vm6 = vcmask 924672  }
  0xec   : > { %v486_v58 = vrot.slane %v479_v53, %v2412_v47  ;;  %v490_v59 = vcombine.low %v469_v51, %v467_v56  ;;  %1398 = vrot.lane.b32.xlu1 %v2337_v28, %s2160_s29  ;;  %v516_v60 = vpop.permute.xlu0 %515 }
  0xed   : > { %v454_v62 = vadd.f32 %v452_v52, %v431_v55  ;;  %v522_v63 = vsel %vm519_vm7, 0.0, %v516_v60  ;;  %v631_v55 = vstv %s2527_s25  ;;  %s2633_s25 = sld [smem:[#allocation7 + $0x25]] }
  0xee   : > { %v488_v0 = vsel %vm470_vm8, %v486_v58, 0.0  ;;  %v497_v1 = vrot.slane %v490_v59, %v2412_v47  ;;  %v518_v2 = vpop.permute.xlu1 %517  ;;  %1404 = vrot.lane.b32.xlu0 %v2334_v27, %s2160_s29 }
  0xef   : > { %v509_v3 = vmul.f32 %v508_v57, %v488_v0  ;;  %v520_v4 = vsel %vm519_vm7, %v516_v60, %v518_v2 }
  0xf0   : > { %v504_v6 = vrot.slane %v497_v1, %v2412_v47  ;;  %v532_v7 = vcombine.low %v522_v63, %v520_v4  ;;  %1406 = vrot.lane.b32.xlu1 %v2343_v31, %s2160_s29  ;;  %v524_v8 = vpop.permute.xlu0 %523  ;;  %s2596_s29 = sld [smem:[#allocation7 + $0x21]] }
  0xf1   : > { %v510_v9 = vadd.f32 %v509_v3, %v454_v62  ;;  %v529_v10 = vsel %vm519_vm7, 0.0, %v524_v8  ;;  %v686_v3 = vstv %s2538_s5  ;;  %s2652_s5 = sld [smem:[#allocation7 + $0xb]] }
  0xf2   : > { %v506_v11 = vsel %vm470_vm8, %v504_v6, 0.0  ;;  %v539_v12 = vrot.slane %v532_v7, %v2412_v47  ;;  %v526_v13 = vpop.permute.xlu1 %525  ;;  %1455 = vrot.lane.b32.xlu0 %v2331_v23, %s2161_s16 }
  0xf3   : > { %v513_v14 = vmul.f32 %v512_v5, %v506_v11  ;;  %v527_v15 = vsel %vm519_vm7, %v524_v8, %v526_v13  ;;  %vm1278_vm7 = vcmask 916480  }
  0xf4   : > { %v546_v17 = vrot.slane %v539_v12, %v2412_v47  ;;  %v550_v18 = vcombine.low %v529_v10, %v527_v15  ;;  %1457 = vrot.lane.b32.xlu1 %v2337_v28, %s2161_s16  ;;  %v576_v19 = vpop.permute.xlu0 %575  ;;  %v690_v12 = vstv %s2549_s6  ;;  %s2662_s6 = sld [smem:[#allocation7 + $0x24]] }
  0xf5   : > { %v514_v20 = vadd.f32 %v513_v14, %v510_v9  ;;  %v582_v21 = vsel %vm579_vm9, 0.0, %v576_v19 }
  0xf6   : > { %v548_v22 = vsel %vm530_vm10, %v546_v17, 0.0  ;;  %v557_v24 = vrot.slane %v550_v18, %v2412_v47  ;;  %v578_v25 = vpop.permute.xlu1 %577  ;;  %1463 = vrot.lane.b32.xlu0 %v2334_v27, %s2161_s16 }
  0xf7   : > { %v569_v26 = vmul.f32 %v568_v16, %v548_v22  ;;  %v580_v29 = vsel %vm579_vm9, %v576_v19, %v578_v25 }
  0xf8   : > { %v564_v32 = vrot.slane %v557_v24, %v2412_v47  ;;  %v591_v33 = vcombine.low %v582_v21, %v580_v29  ;;  %1465 = vrot.lane.b32.xlu1 %v2343_v31, %s2161_s16  ;;  %v584_v34 = vpop.permute.xlu0 %583  ;;  %s2618_s16 = sld [smem:[#allocation7 + $0x22]] }
  0xf9   : > { %v570_v35 = vadd.f32 %v569_v26, %v514_v20  ;;  %v589_v36 = vsel %vm579_vm9, 0.0, %v584_v34 }
  0xfa   : > { %v566_v37 = vsel %vm530_vm10, %v564_v32, 0.0  ;;  %v598_v38 = vrot.slane %v591_v33, %v2412_v47  ;;  %v586_v39 = vpop.permute.xlu1 %585  ;;  %1514 = vrot.lane.b32.xlu0 %v2331_v23, %s2162_s26 }
  0xfb   : > { %v573_v41 = vmul.f32 %v572_v30, %v566_v37  ;;  %v587_v42 = vsel %vm579_vm9, %v584_v34, %v586_v39  ;;  %vm1341_vm9 = vcmask 908288  }
  0xfc   : > { %v605_v44 = vrot.slane %v598_v38, %v2412_v47  ;;  %v609_v45 = vcombine.low %v589_v36, %v587_v42  ;;  %1516 = vrot.lane.b32.xlu1 %v2337_v28, %s2162_s26  ;;  %v635_v46 = vpop.permute.xlu0 %634  ;;  %v711_v38 = vstv %s1894_s11  ;;  %s2739_s11 = sld [smem:[#allocation7 + $0x27]] }
  0xfd   : > { %v574_v48 = vadd.f32 %v573_v41, %v570_v35  ;;  %v641_v49 = vsel %vm638_vm11, 0.0, %v635_v46 }
  0xfe   : > { %v607_v50 = vsel %vm287_vm4, %v605_v44, 0.0  ;;  %v616_v51 = vrot.slane %v609_v45, %v2412_v47  ;;  %v637_v52 = vpop.permute.xlu1 %636  ;;  %1522 = vrot.lane.b32.xlu0 %v2334_v27, %s2162_s26  ;;  %v734_v45 = vstv %s1895_s13  ;;  %s2744_s13 = sld [smem:[#allocation7 + $0xf]] }
  0xff   : > { %v628_v53 = vmul.f32 %v627_v43, %v607_v50  ;;  %v639_v54 = vsel %vm638_vm11, %v635_v46, %v637_v52 }
 0x100   : > { %v623_v56 = vrot.slane %v616_v51, %v2412_v47  ;;  %v650_v57 = vcombine.low %v641_v49, %v639_v54  ;;  %1524 = vrot.lane.b32.xlu1 %v2343_v31, %s2162_s26  ;;  %v643_v58 = vpop.permute.xlu0 %642  ;;  %s2642_s26 = sld [smem:[#allocation7 + $0x23]] }
 0x101   : > { %v629_v59 = vadd.f32 %v628_v53, %v574_v48  ;;  %v648_v60 = vsel %vm638_vm11, 0.0, %v643_v58 }
 0x102   : > { %v625_v62 = vsel %vm287_vm4, %v623_v56, 0.0  ;;  %v657_v63 = vrot.slane %v650_v57, %v2412_v47  ;;  %v645_v0 = vpop.permute.xlu1 %644  ;;  %1573 = vrot.lane.b32.xlu0 %v2331_v23, %s2163_s7 }
 0x103   : > { %v632_v1 = vmul.f32 %v631_v55, %v625_v62  ;;  %v646_v2 = vsel %vm638_vm11, %v643_v58, %v645_v0  ;;  %vm1400_vm11 = vcmask 900096  }
 0x104   : > { %v664_v4 = vrot.slane %v657_v63, %v2412_v47  ;;  %v668_v5 = vcombine.low %v648_v60, %v646_v2  ;;  %1575 = vrot.lane.b32.xlu1 %v2337_v28, %s2163_s7  ;;  %v694_v6 = vpop.permute.xlu0 %693 }
 0x105   : > { %v633_v7 = vadd.f32 %v632_v1, %v629_v59  ;;  %v701_v41 = vsel %vm697_vm12, 0.0, %v694_v6 }
 0x106   : > { %v666_v8 = vsel %vm347_vm5, %v664_v4, 0.0  ;;  %v675_v9 = vrot.slane %v668_v5, %v2412_v47  ;;  %v696_v10 = vpop.permute.xlu1 %695  ;;  %1582 = vrot.lane.b32.xlu0 %v2334_v27, %s2163_s7  ;;  %v712_v50 = vmul.f32 %v711_v38, %v701_v41  ;;  %v812_v41 = vstv %s2596_s29  ;;  %s2752_s29 = sld [smem:[#allocation7 + $0x28]] }
 0x107   : > { %v687_v11 = vmul.f32 %v686_v3, %v666_v8  ;;  %v698_v39 = vsel %vm697_vm12, %v694_v6, %v696_v10 }
 0x108   : > { %v682_v13 = vrot.slane %v675_v9, %v2412_v47  ;;  %1584 = vrot.lane.b32.xlu1 %v2343_v31, %s2163_s7  ;;  %v703_v14 = vpop.permute.xlu0 %702  ;;  %v713_v51 = vmul.f32 %v711_v38, %v698_v39  ;;  %s2707_s7 = sld [smem:[#allocation7 + $0xd]] }
 0x109   : > { %v688_v15 = vadd.f32 %v687_v11, %v633_v7  ;;  %v709_v48 = vsel %vm697_vm12, 0.0, %v703_v14 }
 0x10a   : > { %v684_v16 = vsel %vm347_vm5, %v682_v13, 0.0  ;;  %v705_v17 = vpop.permute.xlu1 %704  ;;  %1636 = vrot.lane.b32.xlu0 %v2331_v23, %s2164_s8  ;;  %v735_v56 = vmul.f32 %v734_v45, %v709_v48  ;;  %v716_v63 = vcombine.low %v712_v50, %v713_v51  ;;  %v867_v50 = vstv %s2604_s22  ;;  %s2758_s22 = sld [smem:[#allocation7 + $0x2a]] }
 0x10b   : > { %v691_v18 = vmul.f32 %v690_v12, %v684_v16  ;;  %v706_v46 = vsel %vm697_vm12, %v703_v14, %v705_v17  ;;  %vm1459_vm12 = vcmask 801792  }
 0x10c   : > { %1638 = vrot.lane.b32.xlu1 %v2337_v28, %s2164_s8  ;;  %v757_v19 = vpop.permute.xlu0 %756  ;;  %v736_v57 = vmul.f32 %v734_v45, %v706_v46  ;;  %v723_v11 = vrot.slane %v716_v63, %v2412_v47 }
 0x10d   : > { %v2571_v20 = vadd.f32 %v691_v18, %v688_v15  ;;  %v763_v44 = vsel %vm760_vm13, 0.0, %v757_v19 }
 0x10e   : > { %v759_v21 = vpop.permute.xlu1 %758  ;;  %1644 = vrot.lane.b32.xlu0 %v2334_v27, %s2164_s8  ;;  %v739_v5 = vcombine.low %v735_v56, %v736_v57 }
 0x10f   : > { %v761_v43 = vsel %vm760_vm13, %v757_v19, %v759_v21 }
 0x110   : > { %1646 = vrot.lane.b32.xlu1 %v2343_v31, %s2164_s8  ;;  %v765_v22 = vpop.permute.xlu0 %764  ;;  %v772_v54 = vcombine.low %v763_v44, %v761_v43  ;;  %v746_v18 = vrot.slane %v739_v5, %v2412_v47  ;;  %s2720_s8 = sld [smem:[#allocation7 + $0x26]] }
 0x111   : > { %v770_v53 = vsel %vm760_vm13, 0.0, %v765_v22 }
 0x112   : > { %v767_v24 = vpop.permute.xlu1 %766  ;;  %1695 = vrot.lane.b32.xlu0 %v2331_v23, %s2165_s12  ;;  %v779_v2 = vrot.slane %v772_v54, %v2412_v47  ;;  %v753_v39 = vrot.slane %v746_v18, %v2412_v47  ;;  %v993_v54 = vstv %s2610_s27  ;;  %s2762_s27 = sld [smem:[#allocation7 + $0x10]] }
 0x113   : > { %v768_v52 = vsel %vm760_vm13, %v765_v22, %v767_v24  ;;  %v994_v5 = vmul.f32 %v993_v54, %v2331_v23  ;;  %vm1518_vm13 = vcmask 793600  }
 0x114   : > { %1697 = vrot.lane.b32.xlu1 %v2337_v28, %s2165_s12  ;;  %v816_v25 = vpop.permute.xlu0 %815  ;;  %v790_v60 = vcombine.low %v770_v53, %v768_v52  ;;  %v786_v14 = vrot.slane %v779_v2, %v2412_v47 }
 0x115   : > { %v822_v59 = vsel %vm819_vm14, 0.0, %v816_v25 }
 0x116   : > { %v818_v26 = vpop.permute.xlu1 %817  ;;  %1703 = vrot.lane.b32.xlu0 %v2334_v27, %s2165_s12  ;;  %v797_v8 = vrot.slane %v790_v60, %v2412_v47 }
 0x117   : > { %v820_v58 = vsel %vm819_vm14, %v816_v25, %v818_v26 }
 0x118   : > { %1705 = vrot.lane.b32.xlu1 %v2343_v31, %s2165_s12  ;;  %v824_v29 = vpop.permute.xlu0 %823  ;;  %v831_v3 = vcombine.low %v822_v59, %v820_v58  ;;  %v804_v22 = vrot.slane %v797_v8, %v2412_v47  ;;  %v871_v59 = vstv %s2618_s16  ;;  %v995_v8 = vmul.f32 %v993_v54, %v2337_v28  ;;  %s2725_s12 = sld [smem:[#allocation7 + $0xe]] }
 0x119   : > { %v829_v1 = vsel %vm819_vm14, 0.0, %v824_v29  ;;  %s2764_s16 = sld [smem:[#allocation7 + $0x29]] }
 0x11a   : > { %v826_v30 = vpop.permute.xlu1 %825  ;;  %v838_v15 = vrot.slane %v831_v3, %v2412_v47  ;;  %v926_v3 = vstv %s2625_s24  ;;  %s2803_s24 = sld [smem:[#allocation7 + $0x12]] }
 0x11b   : > { %v827_v0 = vsel %vm819_vm14, %v824_v29, %v826_v30  ;;  %v730_v29 = vrot.slane %v723_v11, %v2412_v47  ;;  %v808_v30 = vstv %s2589_s14  ;;  %s2747_s14 = sld [smem:[#allocation7 + $0x11]]  ;;  %vm1577_vm14 = vcmask 785408  }
 0x11c   : > { %v875_v32 = vpop.permute.xlu0 %874  ;;  %v849_v9 = vcombine.low %v829_v1, %v827_v0 }
 0x11d   : > { %v881_v7 = vsel %vm878_vm15, 0.0, %v875_v32  ;;  %v732_v48 = vadd.f32 %v730_v29, %v2571_v20 }
 0x11e   : > { %v877_v33 = vpop.permute.xlu1 %876  ;;  %v856_v24 = vrot.slane %v849_v9, %v2412_v47  ;;  %v1016_v9 = vstv %s2633_s25  ;;  %s2810_s25 = sld [smem:[#allocation7 + $0x2b]] }
 0x11f   : > { %v879_v6 = vsel %vm878_vm15, %v875_v32, %v877_v33  ;;  %v755_v57 = vadd.f32 %v753_v39, %v732_v48  ;;  %v1018_v28 = vmul.f32 %v1016_v9, %v2343_v31 }
 0x120   : > { %v883_v34 = vpop.permute.xlu0 %882  ;;  %v890_v16 = vcombine.low %v881_v7, %v879_v6  ;;  %v863_v43 = vrot.slane %v856_v24, %v2412_v47 }
 0x121   : > { %v888_v13 = vsel %vm878_vm15, 0.0, %v883_v34 }
 0x122   : > { %v885_v35 = vpop.permute.xlu1 %884  ;;  %v865_v20 = vsel %vm530_vm10, %v863_v43, 0.0 }
 0x123   : > { %v886_v12 = vsel %vm878_vm15, %v883_v34, %v885_v35  ;;  %v788_v34 = vsel %vm470_vm8, %v786_v14, 0.0  ;;  %v845_v35 = vrot.slane %v838_v15, %v2412_v47  ;;  %v930_v14 = vstv %s2642_s26  ;;  %s2819_s26 = sld [smem:[#allocation7 + $0x13]] }
 0x124   : > { %v934_v36 = vpop.permute.xlu0 %933  ;;  %v908_v25 = vcombine.low %v888_v13, %v886_v12  ;;  %v872_v13 = vmul.f32 %v871_v59, %v865_v20  ;;  %vm1640_vm15 = vcmask 777216  }
 0x125   : > { %v940_v21 = vsel %vm937_vm0, 0.0, %v934_v36  ;;  %v847_v51 = vsel %vm530_vm10, %v845_v35, 0.0  ;;  %v989_v35 = vstv %s2662_s6  ;;  %s2829_s6 = sld [smem:[#allocation7 + $0x14]] }
 0x126   : > { %v936_v37 = vpop.permute.xlu1 %935  ;;  %v915_v44 = vrot.slane %v908_v25, %v2412_v47  ;;  %v868_v2 = vmul.f32 %v867_v50, %v847_v51  ;;  %v998_v25 = vcombine.low %v994_v5, %v995_v8 }
 0x127   : > { %v938_v19 = vsel %vm937_vm0, %v934_v36, %v936_v37  ;;  %v897_v36 = vrot.slane %v890_v16, %v2412_v47 }
 0x128   : > { %v942_v42 = vpop.permute.xlu0 %941  ;;  %v949_v37 = vcombine.low %v940_v21, %v938_v19  ;;  %v922_v60 = vrot.slane %v915_v44, %v2412_v47  ;;  %v1017_v21 = vmul.f32 %v1016_v9, %v2334_v27 }
 0x129   : > { %v947_v33 = vsel %vm937_vm0, 0.0, %v942_v42  ;;  %v904_v52 = vrot.slane %v897_v36, %v2412_v47 }
 0x12a   : > { %v944_v49 = vpop.permute.xlu1 %943  ;;  %v956_v53 = vrot.slane %v949_v37, %v2412_v47  ;;  %v924_v15 = vsel %vm287_vm4, %v922_v60, 0.0  ;;  %v1021_v39 = vcombine.low %v1017_v21, %v1018_v28 }
 0x12b   : > { %v945_v32 = vsel %vm937_vm0, %v942_v42, %v944_v49  ;;  %v806_v42 = vsel %vm470_vm8, %v804_v22, 0.0  ;;  %v809_v49 = vmul.f32 %v808_v30, %v788_v34  ;;  %v906_v6 = vsel %vm287_vm4, %v904_v52, 0.0 }
 0x12c   : > { %v2583_v55 = vpop.permute.xlu0 %1038  ;;  %v967_v45 = vcombine.low %v947_v33, %v945_v32  ;;  %v813_v58 = vmul.f32 %v812_v41, %v806_v42  ;;  %v963_v7 = vrot.slane %v956_v53, %v2412_v47  ;;  %v927_v19 = vmul.f32 %v926_v3, %v906_v6 }
 0x12d   : > { %v810_v1 = vadd.f32 %v809_v49, %v755_v57  ;;  %v985_v22 = vstv %s2652_s5  ;;  %v931_v32 = vmul.f32 %v930_v14, %v924_v15  ;;  %v1005_v41 = vrot.slane %v998_v25, %v2412_v47  ;;  %s2824_s5 = sld [smem:[#allocation7 + $0x2c]] }
 0x12e   : > { %v2587_v62 = vpop.permute.xlu1 %1040  ;;  %v974_v63 = vrot.slane %v967_v45, %v2412_v47  ;;  %v965_v24 = vsel %vm347_vm5, %v963_v7, 0.0  ;;  %v1028_v53 = vrot.slane %v1021_v39, %v2412_v47 }
 0x12f   : > { %v814_v12 = vadd.f32 %v813_v58, %v810_v1  ;;  %v1045_v33 = vsel %vm1042_vm1, %v2587_v62, 0.0  ;;  %v1043_v34 = vsel %vm1042_vm1, %v2583_v55, %v2587_v62  ;;  %v986_v37 = vmul.f32 %v985_v22, %v965_v24 }
 0x130   : > { %v2594_v4 = vpop.permute.xlu0 %1046  ;;  %v981_v23 = vrot.slane %v974_v63, %v2412_v47  ;;  %v1054_v42 = vcombine.low %v1043_v34, %v1045_v33  ;;  %v1012_v58 = vrot.slane %v1005_v41, %v2412_v47  ;;  %v1035_v60 = vrot.slane %v1028_v53, %v2412_v47 }
 0x131   : > { %v869_v18 = vadd.f32 %v868_v2, %v814_v12  ;;  %v1090_v12 = vstv %s2707_s7  ;;  %v1094_v22 = vstv %s2720_s8  ;;  %s2835_s7 = sld [smem:[#allocation7 + $0x16]] }
 0x132   : > { %v2601_v10 = vpop.permute.xlu1 %1048  ;;  %v983_v27 = vsel %vm347_vm5, %v981_v23, 0.0  ;;  %v1061_v54 = vrot.slane %v1054_v42, %v2412_v47  ;;  %v1153_v42 = vstv %s2739_s11  ;;  %s2837_s8 = sld [smem:[#allocation7 + $0x2d]] }
 0x133   : > { %v873_v30 = vadd.f32 %v872_v13, %v869_v18  ;;  %v1052_v43 = vsel %vm1042_vm1, %v2601_v10, 0.0  ;;  %v1050_v44 = vsel %vm1042_vm1, %v2594_v4, %v2601_v10  ;;  %v990_v45 = vmul.f32 %v989_v35, %v983_v27  ;;  %s2856_s11 = sld [smem:[#allocation7 + $0x15]] }
 0x134   : > { %v2612_v17 = vpop.permute.xlu0 %1097  ;;  %v1072_v52 = vcombine.low %v1050_v44, %v1052_v43  ;;  %v1068_v63 = vrot.slane %v1061_v54, %v2412_v47  ;;  %v1212_v54 = vstv %s2752_s29  ;;  %s2890_s29 = sld [smem:[#allocation7 + $0x30]] }
 0x135   : > { %v928_v36 = vadd.f32 %v927_v19, %v873_v30  ;;  %v1149_v30 = vstv %s2725_s12  ;;  %s2843_s12 = sld [smem:[#allocation7 + $0x2f]] }
 0x136   : > { %v2621_v26 = vpop.permute.xlu1 %1099  ;;  %v1079_v20 = vrot.slane %v1072_v52, %v2412_v47 }
 0x137   : > { %v932_v62 = vadd.f32 %v931_v32, %v928_v36  ;;  %v1104_v48 = vsel %vm1101_vm2, %v2621_v26, 0.0  ;;  %v1102_v49 = vsel %vm1101_vm2, %v2612_v17, %v2621_v26 }
 0x138   : > { %v2635_v38 = vpop.permute.xlu0 %1105  ;;  %v1113_v4 = vcombine.low %v1102_v49, %v1104_v48  ;;  %v1086_v9 = vrot.slane %v1079_v20, %v2412_v47 }
 0x139   : > { %v987_v51 = vadd.f32 %v986_v37, %v932_v62 }
 0x13a   : > { %v2645_v46 = vpop.permute.xlu1 %1107  ;;  %v1120_v1 = vrot.slane %v1113_v4, %v2412_v47  ;;  %v1088_v24 = vsel %vm470_vm8, %v1086_v9, 0.0 }
 0x13b   : > { %v991_v57 = vadd.f32 %v990_v45, %v987_v51  ;;  %v1111_v59 = vsel %vm1101_vm2, %v2645_v46, 0.0  ;;  %v1109_v17 = vsel %vm1101_vm2, %v2635_v38, %v2645_v46  ;;  %v1095_v37 = vmul.f32 %v1094_v22, %v1088_v24 }
 0x13c   : > { %v2656_v56 = vpop.permute.xlu0 %1156  ;;  %v1131_v38 = vcombine.low %v1109_v17, %v1111_v59  ;;  %v1127_v13 = vrot.slane %v1120_v1, %v2412_v47  ;;  %v1292_v51 = vstv %s2747_s14  ;;  %s2887_s14 = sld [smem:[#allocation7 + $0x17]] }
 0x13d   : > { %v1014_v3 = vadd.f32 %v1012_v58, %v991_v57 }
 0x13e   : > { %v2665_v0 = vpop.permute.xlu1 %1158  ;;  %v1129_v32 = vsel %vm530_vm10, %v1127_v13, 0.0  ;;  %v1271_v13 = vstv %s2764_s16  ;;  %s1937_s16 = sshll.u32 %s2216_s3, 7 }
 0x13f   : > { %v1163_v46 = vsel %vm1160_vm3, %v2665_v0, 0.0  ;;  %v1161_v5 = vsel %vm1160_vm3, %v2656_v56, %v2665_v0  ;;  %v1037_v23 = vadd.f32 %v1035_v60, %v1014_v3  ;;  %v1070_v56 = vsel %vm470_vm8, %v1068_v63, 0.0 }
 0x140   : > { %v2674_v11 = vpop.permute.xlu0 %1164  ;;  %v1172_v14 = vcombine.low %v1161_v5, %v1163_v46  ;;  %v1138_v0 = vrot.slane %v1131_v38, %v2412_v47  ;;  %v1091_v25 = vmul.f32 %v1090_v12, %v1070_v56  ;;  %v1150_v41 = vmul.f32 %v1149_v30, %v1129_v32 }
 0x141   : > { %v1315_v60 = vstv %s2758_s22  ;;  %v1267_v12 = vstv %s2762_s27  ;;  %s2896_s22 = sld [smem:[#allocation7 + $0x18]] }
 0x142   : > { %v1167_v16 = vpop.permute.xlu1 %1166  ;;  %v1179_v33 = vrot.slane %v1172_v14, %v2412_v47  ;;  %v1145_v34 = vrot.slane %v1138_v0, %v2412_v47  ;;  %v1092_v36 = vadd.f32 %v1091_v25, %v1037_v23  ;;  %s1929_s27 = sld [smem:[#allocation7 + $0x31]] }
 0x143   : > { %v1170_v6 = vsel %vm1160_vm3, %v1167_v16, 0.0  ;;  %v1168_v7 = vsel %vm1160_vm3, %v2674_v11, %v1167_v16 }
 0x144   : > { %v2685_v29 = vpop.permute.xlu0 %1215  ;;  %v1190_v11 = vcombine.low %v1168_v7, %v1170_v6  ;;  %v1186_v43 = vrot.slane %v1179_v33, %v2412_v47  ;;  %v1096_v49 = vadd.f32 %v1095_v37, %v1092_v36 }
 0x146   : > { %v1218_v31 = vpop.permute.xlu1 %1217  ;;  %v1197_v35 = vrot.slane %v1190_v11, %v2412_v47  ;;  %v1151_v59 = vadd.f32 %v1150_v41, %v1096_v49  ;;  %v1188_v20 = vsel %vm287_vm4, %v1186_v43, 0.0 }
 0x147   : > { %v1222_v16 = vsel %vm1219_vm6, %v1218_v31, 0.0  ;;  %v1220_v18 = vsel %vm1219_vm6, %v2685_v29, %v1218_v31 }
 0x148   : > { %v1224_v55 = vpop.permute.xlu0 %1223  ;;  %v1231_v27 = vcombine.low %v1220_v18, %v1222_v16  ;;  %v1204_v62 = vrot.slane %v1197_v35, %v2412_v47 }
 0x14a   : > { %v1226_v50 = vpop.permute.xlu1 %1225  ;;  %v1238_v45 = vrot.slane %v1231_v27, %v2412_v47  ;;  %v1206_v1 = vsel %vm287_vm4, %v1204_v62, 0.0 }
 0x14b   : > { %v1229_v19 = vsel %vm1219_vm6, %v1226_v50, 0.0  ;;  %v1227_v21 = vsel %vm1219_vm6, %v1224_v55, %v1226_v50  ;;  %v1147_v55 = vsel %vm530_vm10, %v1145_v34, 0.0  ;;  %v1208_v50 = vstv %s2744_s13  ;;  %s2863_s13 = sld [smem:[#allocation7 + $0x2e]] }
 0x14c   : > { %v2710_v10 = vpop.permute.xlu0 %1274  ;;  %v1249_v31 = vcombine.low %v1227_v21, %v1229_v19  ;;  %v1154_v17 = vmul.f32 %v1153_v42, %v1147_v55  ;;  %v1245_v3 = vrot.slane %v1238_v45, %v2412_v47  ;;  %v1209_v9 = vmul.f32 %v1208_v50, %v1188_v20 }
 0x14d   : > { %v1389_v50 = vstv %s2803_s24  ;;  %s228_s24 = scalar_lea.vmem [#allocation8], %s1878_s21 }
 0x14e   : > { %v2718_v26 = vpop.permute.xlu1 %1276  ;;  %v1256_v48 = vrot.slane %v1249_v31, %v2412_v47  ;;  %v1155_v14 = vadd.f32 %v1154_v17, %v1151_v59  ;;  %v1247_v11 = vsel %vm347_vm5, %v1245_v3, 0.0  ;;  %v1393_v3 = vstv %s2810_s25  ;;  %s1788_s25 = sshll.u32 %s228_s24, 4  ;;  %s1789_s25 = int_to_ptr.vmem [resolvable:$true] %s1788_s25 }
 0x14f   : > { %v1282_v52 = vsel %vm1278_vm7, %v2718_v26, 0.0  ;;  %v1279_v4 = vsel %vm1278_vm7, %v2710_v10, %v2718_v26  ;;  %v1268_v30 = vmul.f32 %v1267_v12, %v1247_v11 }
 0x150   : > { %v2728_v2 = vpop.permute.xlu0 %1283  ;;  %v1263_v10 = vrot.slane %v1256_v48, %v2412_v47  ;;  %v1294_v26 = vmul.f32 %v1292_v51, %v1282_v52  ;;  %v1293_v38 = vmul.f32 %v1292_v51, %v1279_v4  ;;  %v1210_v24 = vadd.f32 %v1209_v9, %v1155_v14 }
 0x152   : > { %v2734_v8 = vpop.permute.xlu1 %1285  ;;  %v1265_v16 = vsel %vm347_vm5, %v1263_v10, 0.0  ;;  %v1297_v18 = vcombine.low %v1293_v38, %v1294_v26 }
 0x153   : > { %v1290_v46 = vsel %vm1278_vm7, %v2734_v8, 0.0  ;;  %v1287_v5 = vsel %vm1278_vm7, %v2728_v2, %v2734_v8  ;;  %v1272_v35 = vmul.f32 %v1271_v13, %v1265_v16 }
 0x154   : > { %v1338_v15 = vpop.permute.xlu0 %1337  ;;  %v1317_v2 = vmul.f32 %v1315_v60, %v1290_v46  ;;  %v1316_v8 = vmul.f32 %v1315_v60, %v1287_v5  ;;  %v1304_v36 = vrot.slane %v1297_v18, %v2412_v47 }
 0x156   : > { %v1340_v28 = vpop.permute.xlu1 %1339  ;;  %v1320_v27 = vcombine.low %v1316_v8, %v1317_v2 }
 0x157   : > { %v1344_v57 = vsel %vm1341_vm9, %v1340_v28, 0.0  ;;  %v1342_v58 = vsel %vm1341_vm9, %v1338_v15, %v1340_v28  ;;  %v1213_v15 = vmul.f32 %v1212_v54, %v1206_v1  ;;  %v1311_v54 = vrot.slane %v1304_v36, %v2412_v47 }
 0x158   : > { %v1346_v29 = vpop.permute.xlu0 %1345  ;;  %v1353_v6 = vcombine.low %v1342_v58, %v1344_v57  ;;  %v1327_v49 = vrot.slane %v1320_v27, %v2412_v47  ;;  %v1511_v27 = vstv %s2837_s8  ;;  %s2069_s8 = scalar_lea.vmem %s1789_s25, 128 }
 0x159   : > { %v1214_v34 = vadd.f32 %v1213_v15, %v1210_v24  ;;  %v1448_v15 = vstv %s2819_s26  ;;  %v1591_v24 = vstv %s2835_s7  ;;  %s1774_s7 = scalar_lea.sflag [#allocation5], %s2314_s15  ;;  %p2070_p9 = scmp.ne.s32.totalorder %s1789_s25, %s2069_s8 }
 0x15a   : > { %v1348_v39 = vpop.permute.xlu1 %1347  ;;  %v1360_v19 = vrot.slane %v1353_v6, %v2412_v47  ;;  %v1334_v1 = vrot.slane %v1327_v49, %v2412_v47 }
 0x15b   : > { %v1351_v23 = vsel %vm1341_vm9, %v1348_v39, 0.0  ;;  %v1349_v56 = vsel %vm1341_vm9, %v1346_v29, %v1348_v39  ;;  %v1269_v45 = vadd.f32 %v1268_v30, %v1214_v34  ;;  %v1507_v34 = vstv %s2829_s6  ;;  %s1786_s6 = scalar_lea.hbm %s2966_s4, %s1937_s16  ;;  %p2071_p13 = pnand %p2070_p9, %p2983_p11 }
 0x15c   : > { %v1397_v44 = vpop.permute.xlu0 %1396  ;;  %v1371_v25 = vcombine.low %v1349_v56, %v1351_v23  ;;  %v1367_v37 = vrot.slane %v1360_v19, %v2412_v47 }
 0x15d   : > { %p2072_p10 = pneg %p2071_p13 }
 0x15e   : > { %v1399_v53 = vpop.permute.xlu1 %1398  ;;  %v1378_v43 = vrot.slane %v1371_v25, %v2412_v47  ;;  %v1369_v4 = vsel %vm470_vm8, %v1367_v37, 0.0 }
 0x15f   : > { %v1403_v21 = vsel %vm1400_vm11, %v1399_v53, 0.0  ;;  %v1401_v28 = vsel %vm1400_vm11, %v1397_v44, %v1399_v53  ;;  %v1273_v53 = vadd.f32 %v1272_v35, %v1269_v45  ;;  %v1390_v46 = vmul.f32 %v1389_v50, %v1369_v4 }
 0x160   : > { %v1405_v63 = vpop.permute.xlu0 %1404  ;;  %v1412_v31 = vcombine.low %v1401_v28, %v1403_v21  ;;  %v1385_v59 = vrot.slane %v1378_v43, %v2412_v47  ;;  %v1452_v28 = vstv %s2824_s5  ;;  %v1566_v4 = vstv %s2856_s11 }
 0x161   : > { %v1313_v38 = vadd.f32 %v1311_v54, %v1273_v53 }
 0x162   : > { %v1407_v7 = vpop.permute.xlu1 %1406  ;;  %v1419_v51 = vrot.slane %v1412_v31, %v2412_v47  ;;  %v1387_v9 = vsel %vm470_vm8, %v1385_v59, 0.0  ;;  %v1614_v31 = vstv %s2843_s12  ;;  %s2166_s12 = smov [#allocation8]  }
 0x163   : > { %v1410_v32 = vsel %vm1400_vm11, %v1407_v7, 0.0  ;;  %v1408_v33 = vsel %vm1400_vm11, %v1405_v63, %v1407_v7  ;;  %v1394_v2 = vmul.f32 %v1393_v3, %v1387_v9  ;;  %s2073_s3 = sshll.u32 %s2166_s12, 4  ;;  %s2074_s3 = int_to_ptr.vmem [resolvable:$false] %s2073_s3 }
 0x164   : > { %v1456_v0 = vpop.permute.xlu0 %1455  ;;  %v1430_v44 = vcombine.low %v1408_v33, %v1410_v32  ;;  %v1426_v10 = vrot.slane %v1419_v51, %v2412_v47  ;;  %s2075_s21 = scalar_lea.vmem %s2074_s3, 256  ;;  %p2076_p2 = scmp.lt.s32.totalorder %s1789_s25, %s2074_s3 }
 0x165   : > { %p2077_p1 = scmp.lt.s32.totalorder %s2075_s21, %s2069_s8 }
 0x166   : > { %v1458_v22 = vpop.permute.xlu1 %1457  ;;  %v1437_v17 = vrot.slane %v1430_v44, %v2412_v47  ;;  %v1428_v11 = vsel %vm530_vm10, %v1426_v10, 0.0 }
 0x167   : > { %v1462_v39 = vsel %vm1459_vm12, %v1458_v22, 0.0  ;;  %v1460_v41 = vsel %vm1459_vm12, %v1456_v0, %v1458_v22  ;;  %v1336_v0 = vadd.f32 %v1334_v1, %v1313_v38  ;;  %v1449_v25 = vmul.f32 %v1448_v15, %v1428_v11  ;;  %p2078_p0 = por %p2077_p1, %p2076_p2 }
 0x168   : > { %v1464_v29 = vpop.permute.xlu0 %1463  ;;  %v1471_v52 = vcombine.low %v1460_v41, %v1462_v39  ;;  %v1444_v12 = vrot.slane %v1437_v17, %v2412_v47 }
 0x169   : > { %v1391_v21 = vadd.f32 %v1390_v46, %v1336_v0  ;;  %p2079_p3 = pnand %p2078_p0, %p2072_p10 }
 0x16a   : > { %v1466_v42 = vpop.permute.xlu1 %1465  ;;  %v1478_v26 = vrot.slane %v1471_v52, %v2412_v47  ;;  %v1446_v22 = vsel %vm530_vm10, %v1444_v12, 0.0 }
 0x16b   : > { %v1469_v55 = vsel %vm1459_vm12, %v1466_v42, 0.0  ;;  %v1467_v62 = vsel %vm1459_vm12, %v1464_v29, %v1466_v42  ;;  %v1395_v36 = vadd.f32 %v1394_v2, %v1391_v21  ;;  %v1453_v37 = vmul.f32 %v1452_v28, %v1446_v22 }
 0x16c   : > { %v1515_v48 = vpop.permute.xlu0 %1514  ;;  %v1489_v57 = vcombine.low %v1467_v62, %v1469_v55  ;;  %v1485_v16 = vrot.slane %v1478_v26, %v2412_v47  ;;  %v1688_v21 = vstv %s2887_s14 }
 0x16d   : > { %v1450_v45 = vadd.f32 %v1449_v25, %v1395_v36 }
 0x16e   : > { %v1517_v58 = vpop.permute.xlu1 %1516  ;;  %v1496_v5 = vrot.slane %v1489_v57, %v2412_v47  ;;  %v1487_v35 = vsel %vm287_vm4, %v1485_v16, 0.0 }
 0x16f   : > { %v1521_v20 = vsel %vm1518_vm13, %v1517_v58, 0.0  ;;  %v1519_v60 = vsel %vm1518_vm13, %v1515_v48, %v1517_v58  ;;  %v1508_v48 = vmul.f32 %v1507_v34, %v1487_v35  ;;  %v1454_v53 = vadd.f32 %v1453_v37, %v1450_v45 }
 0x170   : > { %v1523_v63 = vpop.permute.xlu0 %1522  ;;  %v1530_v6 = vcombine.low %v1519_v60, %v1521_v20  ;;  %v1503_v8 = vrot.slane %v1496_v5, %v2412_v47  ;;  %v1747_v37 = vstv %s2896_s22 }
 0x171   : > { %v1509_v60 = vadd.f32 %v1508_v48, %v1454_v53  ;;  %v1751_v48 = vstv %s1929_s27 }
 0x172   : > { %v1525_v7 = vpop.permute.xlu1 %1524  ;;  %v1537_v18 = vrot.slane %v1530_v6, %v2412_v47  ;;  %v1505_v39 = vsel %vm287_vm4, %v1503_v8, 0.0  ;;  %vm1699_vm4 = vcmask 769024  }
 0x173   : > { %v1528_v13 = vsel %vm1518_vm13, %v1525_v7, 0.0  ;;  %v1526_v14 = vsel %vm1518_vm13, %v1523_v63, %v1525_v7  ;;  %v1512_v54 = vmul.f32 %v1511_v27, %v1505_v39  ;;  %v1570_v63 = vstv %s2863_s13 }
 0x174   : > { %v1548_v23 = vcombine.low %v1526_v14, %v1528_v13  ;;  %v1574_v56 = vpop.permute.xlu0 %1573  ;;  %v1544_v41 = vrot.slane %v1537_v18, %v2412_v47 }
 0x175   : > { %v1513_v46 = vadd.f32 %v1512_v54, %v1509_v60 }
 0x176   : > { %v1576_v19 = vpop.permute.xlu1 %1575  ;;  %v1555_v30 = vrot.slane %v1548_v23, %v2412_v47  ;;  %v1546_v57 = vsel %vm347_vm5, %v1544_v41, 0.0 }
 0x177   : > { %v1581_v32 = vsel %vm1577_vm14, %v1576_v19, 0.0  ;;  %v1578_v33 = vsel %vm1577_vm14, %v1574_v56, %v1576_v19  ;;  %v1567_v26 = vmul.f32 %v1566_v4, %v1546_v57 }
 0x178   : > { %v1583_v29 = vpop.permute.xlu0 %1582  ;;  %v1593_v43 = vmul.f32 %v1591_v24, %v1581_v32  ;;  %v1592_v44 = vmul.f32 %v1591_v24, %v1578_v33  ;;  %v1562_v49 = vrot.slane %v1555_v30, %v2412_v47  ;;  %v1692_v32 = vstv %s2890_s29 }
 0x179   : > { %v1568_v56 = vadd.f32 %v1567_v26, %v1513_v46 }
 0x17a   : > { %v1585_v42 = vpop.permute.xlu1 %1584  ;;  %v1596_v59 = vcombine.low %v1592_v44, %v1593_v43  ;;  %v1564_v1 = vsel %vm347_vm5, %v1562_v49, 0.0 }
 0x17b   : > { %v1589_v55 = vsel %vm1577_vm14, %v1585_v42, 0.0  ;;  %v1586_v62 = vsel %vm1577_vm14, %v1583_v29, %v1585_v42  ;;  %v1571_v7 = vmul.f32 %v1570_v63, %v1564_v1  ;;  %v2025_v63 = vld [vmem:[%s2320_s30] sm:$0xff] }
 0x17c   : > { %v1637_v50 = vpop.permute.xlu0 %1636  ;;  %v1616_v51 = vmul.f32 %v1614_v31, %v1589_v55  ;;  %v1615_v52 = vmul.f32 %v1614_v31, %v1586_v62  ;;  %v1603_v9 = vrot.slane %v1596_v59, %v2412_v47  ;;  %v1763_v59 = vsub.s32 0, %v2402_v40 }
 0x17d   : > { %v1572_v2 = vadd.f32 %v1571_v7, %v1568_v56 }
 0x17e   : > { %v1639_v58 = vpop.permute.xlu1 %1638  ;;  %v1619_v38 = vcombine.low %v1615_v52, %v1616_v51  ;;  %v1610_v8 = vrot.slane %v1603_v9, %v2412_v47 }
 0x17f   : > { %v1643_v17 = vsel %vm1640_vm15, %v1639_v58, 0.0  ;;  %v1641_v20 = vsel %vm1640_vm15, %v1637_v50, %v1639_v58 }
 0x180   : > { %v1652_v3 = vcombine.low %v1641_v20, %v1643_v17  ;;  %v1645_v10 = vpop.permute.xlu0 %1644  ;;  %v1626_v0 = vrot.slane %v1619_v38, %v2412_v47  ;;  %v1612_v35 = vadd.f32 %v1610_v8, %v1572_v2 }
 0x182   : > { %v1659_v5 = vrot.slane %v1652_v3, %v2412_v47  ;;  %v1647_v6 = vpop.permute.xlu1 %1646  ;;  %v1633_v30 = vrot.slane %v1626_v0, %v2412_v47 }
 0x183   : > { %v1650_v12 = vsel %vm1640_vm15, %v1647_v6, 0.0  ;;  %v1648_v13 = vsel %vm1640_vm15, %v1645_v10, %v1647_v6 }
 0x184   : > { %v1666_v14 = vrot.slane %v1659_v5, %v2412_v47  ;;  %v1670_v15 = vcombine.low %v1648_v13, %v1650_v12  ;;  %v1696_v23 = vpop.permute.xlu0 %1695  ;;  %v1635_v42 = vadd.f32 %v1633_v30, %v1612_v35 }
 0x186   : > { %v1677_v11 = vrot.slane %v1670_v15, %v2412_v47  ;;  %v1698_v16 = vpop.permute.xlu1 %1697  ;;  %v1668_v28 = vsel %vm470_vm8, %v1666_v14, 0.0 }
 0x187   : > { %v1702_v18 = vsel %vm1699_vm4, %v1698_v16, 0.0  ;;  %v1700_v19 = vsel %vm1699_vm4, %v1696_v23, %v1698_v16  ;;  %v1689_v27 = vmul.f32 %v1688_v21, %v1668_v28 }
 0x188   : > { %v1684_v22 = vrot.slane %v1677_v11, %v2412_v47  ;;  %v1711_v24 = vcombine.low %v1700_v19, %v1702_v18  ;;  %v1704_v25 = vpop.permute.xlu0 %1703 }
 0x189   : > { %v1690_v62 = vadd.f32 %v1689_v27, %v1635_v42 }
 0x18a   : > { %v1686_v33 = vsel %vm470_vm8, %v1684_v22, 0.0  ;;  %v1718_v29 = vrot.slane %v1711_v24, %v2412_v47  ;;  %v1706_v34 = vpop.permute.xlu1 %1705 }
 0x18b   : > { %v1709_v31 = vsel %vm1699_vm4, %v1706_v34, 0.0  ;;  %v1707_v36 = vsel %vm1699_vm4, %v1704_v25, %v1706_v34  ;;  %v1693_v43 = vmul.f32 %v1692_v32, %v1686_v33 }
 0x18c   : > { %v1725_v39 = vrot.slane %v1718_v29, %v2412_v47  ;;  %v1729_v41 = vcombine.low %v1707_v36, %v1709_v31 }
 0x18d   : > { %v1694_v50 = vadd.f32 %v1693_v43, %v1690_v62 }
 0x18e   : > { %v1727_v44 = vsel %vm530_vm10, %v1725_v39, 0.0  ;;  %v1736_v55 = vrot.slane %v1729_v41, %v2412_v47 }
 0x18f   : > { %v1748_v45 = vmul.f32 %v1747_v37, %v1727_v44 }
 0x190   : > { %v1743_v49 = vrot.slane %v1736_v55, %v2412_v47  ;;  %v1767_v47 = vsub.s32 1, %v2402_v40 }
 0x191   : > { %v1749_v52 = vadd.f32 %v1748_v45, %v1694_v50 }
 0x192   : > { %v1745_v51 = vsel %vm530_vm10, %v1743_v49, 0.0 }
 0x193   : > { %v1752_v53 = vmul.f32 %v1751_v48, %v1745_v51 }
 0x195   : > { %v1753_v54 = vadd.f32 %v1752_v53, %v1749_v52 }
 0x197   : > { %v1930_v4 = vmul.f32 -1.442695, %v1753_v54 }
 0x199   : > { %2021 = vpow2.f32 %v1930_v4 }
 0x1a6   : > { %v2022_v57 = vpop.eup %2021 }
 0x1a7   : > { %v1757_v58 = vadd.f32 1.0, %v2022_v57 }
 0x1a9   : > { %2023 = vrcp.f32 %v1757_v58 }
 0x1b6   : > { %v2024_v17 = vpop.eup %2023 }
 0x1b7   : > { %v1764_v20 = vrot.slane %v2024_v17, %v1763_v59  ;;  %v1768_v61 = vrot.slane %v2024_v17, %v1767_v47 }
 0x1b9   : > { %v1769_v60 = vcombine.low %v1764_v20, %v1768_v61 }
 0x1bb   : > { %v1771_v1 = vmul.f32 %v2025_v63, %v1769_v60 }
 0x1bd   : > { %1772 = vst [vmem:[%s228_s24] sm:$0xff] %v1771_v1 }
 0x1be   : > { %2082 = shalt.err (!%p2079_p3)
}
 0x1bf   : > { %s2083_s30 = scalar_lea.hbm %s1786_s6, 128  ;;  %s2087_s13 = scalar_lea.hbm %s2966_s4, 256 }
 0x1c0   : > { %p2084_p12 = scmp.ne.s32.totalorder %s1786_s6, %s2083_s30  ;;  %p2088_p4 = scmp.lt.s32.totalorder %s1786_s6, %s2966_s4 }
 0x1c1   : > { %p2089_p6 = scmp.lt.s32.totalorder %s2087_s13, %s2083_s30 }
 0x1c2   : > { %p2085_p5 = pnand %p2084_p12, %p2983_p11 }
 0x1c3   : > { %p2090_p8 = por %p2089_p6, %p2088_p4 }
 0x1c4   : > { %p2086_p7 = pneg %p2085_p5 }
 0x1c6   : > { %p2091_p9 = pnand %p2090_p8, %p2086_p7 }
 0x1c8   : > { %2094 = shalt.err (!%p2091_p9)
}
 0x1c9   : > { %1944 = dma.vmem_to_hbm [thread:$0]  (%p2983_p11), %s1789_s25, 128, %s1786_s6, %s1774_s7  }
 0x1ca PF: > { %s1800_s22 = sand.u32 1, %s2125_s17   ;;  %p2984_p13 = scmp.ne.s32.totalorder %s2972_s23, 0 }
 0x1cb   : > { %p2985_p10 = scmp.ge.s32.totalorder %s2137_s20, 2  ;;  %s1801_s27 = scalar_lea.sflag [#allocation5], %s1800_s22 }
 0x1cd   : > { %p1955_p2 = pnand %p2985_p10, %p2984_p13 }
 0x1cf   : > { %p1956_p1 = pneg %p1955_p2 }
 0x1d1   : > { %2120 = dma.done.wait (%p1956_p1), %s1801_s27, 128  }
 0x1d2   : > { %2122 = vsyncadd (%p1956_p1), %s1801_s27, 4294967168  ;;  %p19_p0 = scmp.ge.s32.totalorder %s2246_s28, 4   ;;  %s2986_s17 = smov %s2129_s18 }
 0x1d3   : > { %s2987_s18 = smov %s2133_s19  ;;  %s2988_s19 = smov %s2270_s9 }
 0x1d4   : > { %s2989_s20 = smov %s2246_s28  ;;  %21 = sbr.rel (!%p19_p0) target bundleno = 8 (0x8), region = 86 }
 0x1d9   :  { %1806 = vsyncpa [#allocation4], 1 }
 0x1da   :  { %1808 = vsyncpa [#allocation4 + $0x1], 1 }
 0x1db   :  { %1809 = vsyncpa [#allocation5], 1 }
 0x1dc   :  { %1811 = vsyncpa [#allocation5 + $0x1], 1 }
 0x1dd   :  { %1812 = vsyncpa [#allocation6], 1 }
 0x1de   :  { %1814 = vsyncpa [#allocation6 + $0x1], 1 }

</bundles_post_ra>
